<compile_context>
chip_gen: v5e
topology: v5e:2x2
jax: 0.10.0
libtpu: 0.0.40
codegen_flags: <defaults>
</compile_context>

<pallas_src>
import functools

import jax
import jax.numpy as jnp
import numpy as np
from jax import lax
from jax.experimental import pallas as pl
from jax.experimental.pallas import tpu as pltpu

LRELU_SLOPE = 0.2
BN_EPS = 1e-5
VMEM_LIMIT = 32 * 1024 * 1024
KSIZE, STRIDE, PAD = 4, 2, 1


# ------------------------- fused Pallas kernel -------------------------

def _leaky_relu(y, slope):
    return jnp.maximum(y, slope * y)


def _encoder_kernel(x_ref, m1_ref,
                    m2_ref, g2_ref, bf2_ref, red2_ref, exp2_ref,
                    m3_ref, g3_ref, bf3_ref, red3_ref, exp3_ref,
                    m4_ref, g4_ref, bf4_ref, red4_ref, exp4_ref,
                    fcw_ref, fcb_ref, o_ref, *, slope, eps):
    """Whole encoder in one kernel.

    Activation layout: (N, Ho*Wo*C) rows, lanes flattened NHWC per sample
    (spatial-major, channel-minor).  Each conv is a single matmul with a
    precomputed operator matrix; BatchNorm uses small per-channel
    reduce (`red`: (S*C, C)) and expand (`exp`: (C, S*C)) operator matmuls.
    """
    n = x_ref.shape[0]
    ones_row = jnp.ones((1, n), jnp.float32)

    def matmul(a, b):
        return jnp.dot(a, b, preferred_element_type=jnp.float32)

    def bn_lrelu(y, g_ref, bf_ref, red_ref, exp_ref):
        sc = y.shape[1]
        c = red_ref.shape[1]
        inv_count = 1.0 / (n * (sc // c))          # 1 / (batch * spatial)
        mean_c = matmul(matmul(ones_row, y), red_ref[...]) * inv_count
        cen = y - matmul(mean_c, exp_ref[...])
        var_c = matmul(matmul(ones_row, cen * cen), red_ref[...]) * inv_count
        scale_c = g_ref[...] * lax.rsqrt(var_c + eps)
        yn = cen * matmul(scale_c, exp_ref[...]) + bf_ref[...]
        return _leaky_relu(yn, slope)

    # Layer 1: conv + LeakyReLU (no BatchNorm).
    a = _leaky_relu(matmul(x_ref[...], m1_ref[...]), slope)
    # Layers 2-4: conv + BatchNorm (training-mode, biased var) + LeakyReLU.
    a = bn_lrelu(matmul(a, m2_ref[...]), g2_ref, bf2_ref, red2_ref, exp2_ref)
    a = bn_lrelu(matmul(a, m3_ref[...]), g3_ref, bf3_ref, red3_ref, exp3_ref)
    a = bn_lrelu(matmul(a, m4_ref[...]), g4_ref, bf4_ref, red4_ref, exp4_ref)
    # conv4 output is spatially 1x1, so its rows are exactly the torch
    # `x.squeeze()` features -> fused final nn.Linear.
    o_ref[...] = matmul(a, fcw_ref[...]) + fcb_ref[...]


# ------------------------- one-time parameter prep -------------------------

def _conv_as_matrix(w, height, width):
    """OIHW conv weight -> dense operator mapping a flattened NHWC image
    (H*W*Cin,) to the flattened NHWC conv output (Ho*Wo*Cout,) for the
    module's fixed 4x4 / stride-2 / pad-1 convolution."""
    cout, cin, k, _ = w.shape
    ho = (height + 2 * PAD - KSIZE) // STRIDE + 1
    wo = (width + 2 * PAD - KSIZE) // STRIDE + 1
    w_np = np.asarray(w, np.float32)
    m = np.zeros((height * width * cin, ho * wo * cout), np.float32)
    for oh in range(ho):
        for ow in range(wo):
            col0 = (oh * wo + ow) * cout
            for kh in range(KSIZE):
                ih = STRIDE * oh + kh - PAD
                if ih < 0 or ih >= height:
                    continue
                for kw in range(KSIZE):
                    iw = STRIDE * ow + kw - PAD
                    if iw < 0 or iw >= width:
                        continue
                    row0 = (ih * width + iw) * cin
                    m[row0:row0 + cin, col0:col0 + cout] = w_np[:, :, kh, kw].T
    return m, ho, wo


def _bn_operators(c, s):
    """Per-channel reduce/expand operators for the spatial-major,
    channel-minor lane layout."""
    exp = np.tile(np.eye(c, dtype=np.float32), (1, s))   # (C, S*C)
    red = np.ascontiguousarray(exp.T)                     # (S*C, C)
    return red, exp


def prepare_params(params, height, width):
    """One-time layout prep (call once, reuse across forwards): fold each conv
    into a dense matmul operator, build BN reduce/expand operators, expand the
    BN beta into the flattened lane layout, transpose the fc weight."""
    p = {}
    p["m1"], height, width = _conv_as_matrix(params["w1"], height, width)
    for idx, (wk, gk, bk) in enumerate(
            (("w2", "g2", "b2"), ("w3", "g3", "b3"), ("w4", "g4", "b4")), start=2):
        m, height, width = _conv_as_matrix(params[wk], height, width)
        c = params[wk].shape[0]
        s = height * width
        red, exp = _bn_operators(c, s)
        p[f"m{idx}"] = m
        p[f"g{idx}"] = np.asarray(params[gk], np.float32).reshape(1, c)
        p[f"bf{idx}"] = np.tile(np.asarray(params[bk], np.float32), s).reshape(1, s * c)
        p[f"red{idx}"] = red
        p[f"exp{idx}"] = exp
    p["fcw"] = np.ascontiguousarray(np.asarray(params["fc_w"], np.float32).T)
    p["fcb"] = np.asarray(params["fc_b"], np.float32).reshape(1, -1)
    return {k: jnp.asarray(v) for k, v in p.items()}


# ------------------------- forward wrapper -------------------------

_OPERAND_ORDER = (["m1"]
                  + [f"{base}{i}" for i in (2, 3, 4)
                     for base in ("m", "g", "bf", "red", "exp")]
                  + ["fcw", "fcb"])


def encoder_forward(x, prepped):
    n = x.shape[0]
    n_z = prepped["fcw"].shape[1]
    # NCHW -> flattened NHWC rows: the only per-forward layout op outside the kernel.
    x_rows = jnp.transpose(x, (0, 2, 3, 1)).reshape(n, -1)
    operands = [x_rows] + [prepped[k] for k in _OPERAND_ORDER]

    # Advisory cost estimate (real operand bytes; rsqrt counted as transcendental).
    flops = 2 * n * sum(prepped[k].shape[0] * prepped[k].shape[1]
                        for k in ("m1", "m2", "m3", "m4", "fcw"))
    transcendentals = 0
    for i in (2, 3, 4):
        sc, c = prepped[f"red{i}"].shape
        flops += 4 * n * sc + 8 * sc * c + 8 * n * sc   # BN stat matmuls + elementwise
        transcendentals += c
    bytes_accessed = 4 * (int(np.prod(x_rows.shape))
                          + sum(int(np.prod(v.shape)) for v in operands[1:])
                          + n * n_z)

    vmem = pl.BlockSpec(memory_space=pltpu.MemorySpace.VMEM)
    return pl.pallas_call(
        functools.partial(_encoder_kernel, slope=LRELU_SLOPE, eps=BN_EPS),
        out_shape=jax.ShapeDtypeStruct((n, n_z), jnp.float32),
        in_specs=[vmem] * len(operands),
        out_specs=vmem,
        compiler_params=pltpu.CompilerParams(vmem_limit_bytes=VMEM_LIMIT),
        cost_estimate=pl.CostEstimate(flops=int(flops),
                                      transcendentals=int(transcendentals),
                                      bytes_accessed=int(bytes_accessed)),
    )(*operands)


# ------------------------- pure-JAX reference -------------------------

def reference_forward(x, params, eps=1e-5, slope=0.2):
    hp = lax.Precision.HIGHEST

    def conv(y, w):
        return lax.conv_general_dilated(
            y, w, (2, 2), ((1, 1), (1, 1)),
            dimension_numbers=("NCHW", "OIHW", "NCHW"), precision=hp)

    y = conv(x, params["w1"])
    y = jnp.where(y >= 0, y, slope * y)
    for w, g, b in [(params["w2"], params["g2"], params["b2"]),
                    (params["w3"], params["g3"], params["b3"]),
                    (params["w4"], params["g4"], params["b4"])]:
        y = conv(y, w)
        m = y.mean(axis=(0, 2, 3), keepdims=True)
        v = jnp.square(y - m).mean(axis=(0, 2, 3), keepdims=True)
        y = (y - m) / jnp.sqrt(v + eps) * g.reshape(1, -1, 1, 1) + b.reshape(1, -1, 1, 1)
        y = jnp.where(y >= 0, y, slope * y)
    y = y.reshape(y.shape[0], y.shape[1])
    return jnp.dot(y, params["fc_w"].T, precision=hp) + params["fc_b"]


# ------------------------- main -------------------------

if __name__ == "__main__":
    # Small config consistent with the module: 4 stride-2 convs reduce 16 -> 1.
    n_channel, dim_h, n_z = 1, 8, 32
    N, H, W = 2, 16, 16

    key = jax.random.PRNGKey(0)
    ks = jax.random.split(key, 13)
    params = {
        "w1": jax.random.normal(ks[0], (dim_h, n_channel, 4, 4), jnp.float32) * 0.1,
        "w2": jax.random.normal(ks[1], (dim_h * 2, dim_h, 4, 4), jnp.float32) * 0.1,
        "w3": jax.random.normal(ks[2], (dim_h * 4, dim_h * 2, 4, 4), jnp.float32) * 0.1,
        "w4": jax.random.normal(ks[3], (dim_h * 8, dim_h * 4, 4, 4), jnp.float32) * 0.1,
        # Non-trivial BN affine params so the gamma/beta paths are exercised.
        "g2": 1.0 + 0.1 * jax.random.normal(ks[4], (dim_h * 2,), jnp.float32),
        "b2": 0.1 * jax.random.normal(ks[5], (dim_h * 2,), jnp.float32),
        "g3": 1.0 + 0.1 * jax.random.normal(ks[6], (dim_h * 4,), jnp.float32),
        "b3": 0.1 * jax.random.normal(ks[7], (dim_h * 4,), jnp.float32),
        "g4": 1.0 + 0.1 * jax.random.normal(ks[8], (dim_h * 8,), jnp.float32),
        "b4": 0.1 * jax.random.normal(ks[9], (dim_h * 8,), jnp.float32),
        "fc_w": jax.random.normal(ks[10], (n_z, dim_h * 8), jnp.float32) * 0.1,
        "fc_b": jax.random.normal(ks[11], (n_z,), jnp.float32) * 0.1,
    }
    x = jax.random.normal(ks[12], (N, n_channel, H, W), jnp.float32)

    prepped = prepare_params(params, H, W)     # one-time layout prep
    fwd = jax.jit(encoder_forward)
    out = jax.block_until_ready(fwd(x, prepped))
    assert out.shape == (N, n_z)

    ref = jax.block_until_ready(reference_forward(x, params))
    np.testing.assert_allclose(np.asarray(out), np.asarray(ref), rtol=2e-4, atol=2e-4)

    print("KERNEL_OK")
</pallas_src>

<mosaic_0001>
module attributes {stable_mosaic.version = 11 : i64} {
  func.func @_encoder_kernel(%arg0: memref<2x256xf32, #tpu.memory_space<vmem>>, %arg1: memref<256x512xf32, #tpu.memory_space<vmem>>, %arg2: memref<512x256xf32, #tpu.memory_space<vmem>>, %arg3: memref<1x16xf32, #tpu.memory_space<vmem>>, %arg4: memref<1x256xf32, #tpu.memory_space<vmem>>, %arg5: memref<256x16xf32, #tpu.memory_space<vmem>>, %arg6: memref<16x256xf32, #tpu.memory_space<vmem>>, %arg7: memref<256x128xf32, #tpu.memory_space<vmem>>, %arg8: memref<1x32xf32, #tpu.memory_space<vmem>>, %arg9: memref<1x128xf32, #tpu.memory_space<vmem>>, %arg10: memref<128x32xf32, #tpu.memory_space<vmem>>, %arg11: memref<32x128xf32, #tpu.memory_space<vmem>>, %arg12: memref<128x64xf32, #tpu.memory_space<vmem>>, %arg13: memref<1x64xf32, #tpu.memory_space<vmem>>, %arg14: memref<1x64xf32, #tpu.memory_space<vmem>>, %arg15: memref<64x64xf32, #tpu.memory_space<vmem>>, %arg16: memref<64x64xf32, #tpu.memory_space<vmem>>, %arg17: memref<64x32xf32, #tpu.memory_space<vmem>>, %arg18: memref<1x32xf32, #tpu.memory_space<vmem>>, %arg19: memref<2x32xf32, #tpu.memory_space<vmem>>) attributes {dimension_semantics = [], scalar_prefetch = 0 : i64, scratch_operands = 0 : i64, tpu.core_type = #tpu.core_type<tc>} {
    %cst = arith.constant 1.000000e+00 : f32
    %0 = vector.broadcast %cst : f32 to vector<1x2xf32>
    %c0 = arith.constant 0 : index
    %c0_0 = arith.constant 0 : index
    %1 = vector.load %arg0[%c0, %c0_0] : memref<2x256xf32, #tpu.memory_space<vmem>>, vector<2x256xf32>
    %c0_1 = arith.constant 0 : index
    %c0_2 = arith.constant 0 : index
    %2 = vector.load %arg1[%c0_1, %c0_2] : memref<256x512xf32, #tpu.memory_space<vmem>>, vector<256x512xf32>
    %cst_3 = arith.constant dense<0.000000e+00> : vector<2x512xf32>
    %3 = tpu.matmul %1, %2, %cst_3 {dimension_numbers = #tpu.dot_dimension_numbers<[1], [0], [0], [1], [0, 0, 1, 1], [], []>} : vector<2x256xf32>, vector<256x512xf32>, vector<2x512xf32> -> vector<2x512xf32>
    %cst_4 = arith.constant 2.000000e-01 : f32
    %4 = vector.broadcast %cst_4 : f32 to vector<2x512xf32>
    %5 = arith.mulf %4, %3 : vector<2x512xf32>
    %6 = arith.maximumf %3, %5 : vector<2x512xf32>
    %c0_5 = arith.constant 0 : index
    %c0_6 = arith.constant 0 : index
    %7 = vector.load %arg2[%c0_5, %c0_6] : memref<512x256xf32, #tpu.memory_space<vmem>>, vector<512x256xf32>
    %cst_7 = arith.constant dense<0.000000e+00> : vector<2x256xf32>
    %8 = tpu.matmul %6, %7, %cst_7 {dimension_numbers = #tpu.dot_dimension_numbers<[1], [0], [0], [1], [0, 0, 1, 1], [], []>} : vector<2x512xf32>, vector<512x256xf32>, vector<2x256xf32> -> vector<2x256xf32>
    %cst_8 = arith.constant dense<0.000000e+00> : vector<1x256xf32>
    %9 = tpu.matmul %0, %8, %cst_8 {dimension_numbers = #tpu.dot_dimension_numbers<[1], [0], [0], [1], [0, 0, 1, 1], [], []>} : vector<1x2xf32>, vector<2x256xf32>, vector<1x256xf32> -> vector<1x256xf32>
    %c0_9 = arith.constant 0 : index
    %c0_10 = arith.constant 0 : index
    %10 = vector.load %arg5[%c0_9, %c0_10] : memref<256x16xf32, #tpu.memory_space<vmem>>, vector<256x16xf32>
    %cst_11 = arith.constant dense<0.000000e+00> : vector<1x16xf32>
    %11 = tpu.matmul %9, %10, %cst_11 {dimension_numbers = #tpu.dot_dimension_numbers<[1], [0], [0], [1], [0, 0, 1, 1], [], []>} : vector<1x256xf32>, vector<256x16xf32>, vector<1x16xf32> -> vector<1x16xf32>
    %cst_12 = arith.constant 3.125000e-02 : f32
    %12 = vector.broadcast %cst_12 : f32 to vector<1x16xf32>
    %13 = arith.mulf %11, %12 : vector<1x16xf32>
    %c0_13 = arith.constant 0 : index
    %c0_14 = arith.constant 0 : index
    %14 = vector.load %arg6[%c0_13, %c0_14] : memref<16x256xf32, #tpu.memory_space<vmem>>, vector<16x256xf32>
    %cst_15 = arith.constant dense<0.000000e+00> : vector<1x256xf32>
    %15 = tpu.matmul %13, %14, %cst_15 {dimension_numbers = #tpu.dot_dimension_numbers<[1], [0], [0], [1], [0, 0, 1, 1], [], []>} : vector<1x16xf32>, vector<16x256xf32>, vector<1x256xf32> -> vector<1x256xf32>
    %16 = vector.broadcast %15 : vector<1x256xf32> to vector<2x256xf32>
    %17 = arith.subf %8, %16 : vector<2x256xf32>
    %18 = arith.mulf %17, %17 : vector<2x256xf32>
    %cst_16 = arith.constant dense<0.000000e+00> : vector<1x256xf32>
    %19 = tpu.matmul %0, %18, %cst_16 {dimension_numbers = #tpu.dot_dimension_numbers<[1], [0], [0], [1], [0, 0, 1, 1], [], []>} : vector<1x2xf32>, vector<2x256xf32>, vector<1x256xf32> -> vector<1x256xf32>
    %c0_17 = arith.constant 0 : index
    %c0_18 = arith.constant 0 : index
    %20 = vector.load %arg5[%c0_17, %c0_18] : memref<256x16xf32, #tpu.memory_space<vmem>>, vector<256x16xf32>
    %cst_19 = arith.constant dense<0.000000e+00> : vector<1x16xf32>
    %21 = tpu.matmul %19, %20, %cst_19 {dimension_numbers = #tpu.dot_dimension_numbers<[1], [0], [0], [1], [0, 0, 1, 1], [], []>} : vector<1x256xf32>, vector<256x16xf32>, vector<1x16xf32> -> vector<1x16xf32>
    %cst_20 = arith.constant 3.125000e-02 : f32
    %22 = vector.broadcast %cst_20 : f32 to vector<1x16xf32>
    %23 = arith.mulf %21, %22 : vector<1x16xf32>
    %c0_21 = arith.constant 0 : index
    %c0_22 = arith.constant 0 : index
    %24 = vector.load %arg3[%c0_21, %c0_22] : memref<1x16xf32, #tpu.memory_space<vmem>>, vector<1x16xf32>
    %cst_23 = arith.constant 9.99999974E-6 : f32
    %25 = vector.broadcast %cst_23 : f32 to vector<1x16xf32>
    %26 = arith.addf %23, %25 : vector<1x16xf32>
    %27 = math.rsqrt %26 : vector<1x16xf32>
    %28 = arith.mulf %24, %27 : vector<1x16xf32>
    %c0_24 = arith.constant 0 : index
    %c0_25 = arith.constant 0 : index
    %29 = vector.load %arg6[%c0_24, %c0_25] : memref<16x256xf32, #tpu.memory_space<vmem>>, vector<16x256xf32>
    %cst_26 = arith.constant dense<0.000000e+00> : vector<1x256xf32>
    %30 = tpu.matmul %28, %29, %cst_26 {dimension_numbers = #tpu.dot_dimension_numbers<[1], [0], [0], [1], [0, 0, 1, 1], [], []>} : vector<1x16xf32>, vector<16x256xf32>, vector<1x256xf32> -> vector<1x256xf32>
    %31 = vector.broadcast %30 : vector<1x256xf32> to vector<2x256xf32>
    %32 = arith.mulf %17, %31 : vector<2x256xf32>
    %c0_27 = arith.constant 0 : index
    %c0_28 = arith.constant 0 : index
    %33 = vector.load %arg4[%c0_27, %c0_28] : memref<1x256xf32, #tpu.memory_space<vmem>>, vector<1x256xf32>
    %34 = vector.broadcast %33 : vector<1x256xf32> to vector<2x256xf32>
    %35 = arith.addf %32, %34 : vector<2x256xf32>
    %cst_29 = arith.constant 2.000000e-01 : f32
    %36 = vector.broadcast %cst_29 : f32 to vector<2x256xf32>
    %37 = arith.mulf %36, %35 : vector<2x256xf32>
    %38 = arith.maximumf %35, %37 : vector<2x256xf32>
    %c0_30 = arith.constant 0 : index
    %c0_31 = arith.constant 0 : index
    %39 = vector.load %arg7[%c0_30, %c0_31] : memref<256x128xf32, #tpu.memory_space<vmem>>, vector<256x128xf32>
    %cst_32 = arith.constant dense<0.000000e+00> : vector<2x128xf32>
    %40 = tpu.matmul %38, %39, %cst_32 {dimension_numbers = #tpu.dot_dimension_numbers<[1], [0], [0], [1], [0, 0, 1, 1], [], []>} : vector<2x256xf32>, vector<256x128xf32>, vector<2x128xf32> -> vector<2x128xf32>
    %cst_33 = arith.constant dense<0.000000e+00> : vector<1x128xf32>
    %41 = tpu.matmul %0, %40, %cst_33 {dimension_numbers = #tpu.dot_dimension_numbers<[1], [0], [0], [1], [0, 0, 1, 1], [], []>} : vector<1x2xf32>, vector<2x128xf32>, vector<1x128xf32> -> vector<1x128xf32>
    %c0_34 = arith.constant 0 : index
    %c0_35 = arith.constant 0 : index
    %42 = vector.load %arg10[%c0_34, %c0_35] : memref<128x32xf32, #tpu.memory_space<vmem>>, vector<128x32xf32>
    %cst_36 = arith.constant dense<0.000000e+00> : vector<1x32xf32>
    %43 = tpu.matmul %41, %42, %cst_36 {dimension_numbers = #tpu.dot_dimension_numbers<[1], [0], [0], [1], [0, 0, 1, 1], [], []>} : vector<1x128xf32>, vector<128x32xf32>, vector<1x32xf32> -> vector<1x32xf32>
    %cst_37 = arith.constant 1.250000e-01 : f32
    %44 = vector.broadcast %cst_37 : f32 to vector<1x32xf32>
    %45 = arith.mulf %43, %44 : vector<1x32xf32>
    %c0_38 = arith.constant 0 : index
    %c0_39 = arith.constant 0 : index
    %46 = vector.load %arg11[%c0_38, %c0_39] : memref<32x128xf32, #tpu.memory_space<vmem>>, vector<32x128xf32>
    %cst_40 = arith.constant dense<0.000000e+00> : vector<1x128xf32>
    %47 = tpu.matmul %45, %46, %cst_40 {dimension_numbers = #tpu.dot_dimension_numbers<[1], [0], [0], [1], [0, 0, 1, 1], [], []>} : vector<1x32xf32>, vector<32x128xf32>, vector<1x128xf32> -> vector<1x128xf32>
    %48 = vector.broadcast %47 : vector<1x128xf32> to vector<2x128xf32>
    %49 = arith.subf %40, %48 : vector<2x128xf32>
    %50 = arith.mulf %49, %49 : vector<2x128xf32>
    %cst_41 = arith.constant dense<0.000000e+00> : vector<1x128xf32>
    %51 = tpu.matmul %0, %50, %cst_41 {dimension_numbers = #tpu.dot_dimension_numbers<[1], [0], [0], [1], [0, 0, 1, 1], [], []>} : vector<1x2xf32>, vector<2x128xf32>, vector<1x128xf32> -> vector<1x128xf32>
    %c0_42 = arith.constant 0 : index
    %c0_43 = arith.constant 0 : index
    %52 = vector.load %arg10[%c0_42, %c0_43] : memref<128x32xf32, #tpu.memory_space<vmem>>, vector<128x32xf32>
    %cst_44 = arith.constant dense<0.000000e+00> : vector<1x32xf32>
    %53 = tpu.matmul %51, %52, %cst_44 {dimension_numbers = #tpu.dot_dimension_numbers<[1], [0], [0], [1], [0, 0, 1, 1], [], []>} : vector<1x128xf32>, vector<128x32xf32>, vector<1x32xf32> -> vector<1x32xf32>
    %cst_45 = arith.constant 1.250000e-01 : f32
    %54 = vector.broadcast %cst_45 : f32 to vector<1x32xf32>
    %55 = arith.mulf %53, %54 : vector<1x32xf32>
    %c0_46 = arith.constant 0 : index
    %c0_47 = arith.constant 0 : index
    %56 = vector.load %arg8[%c0_46, %c0_47] : memref<1x32xf32, #tpu.memory_space<vmem>>, vector<1x32xf32>
    %cst_48 = arith.constant 9.99999974E-6 : f32
    %57 = vector.broadcast %cst_48 : f32 to vector<1x32xf32>
    %58 = arith.addf %55, %57 : vector<1x32xf32>
    %59 = math.rsqrt %58 : vector<1x32xf32>
    %60 = arith.mulf %56, %59 : vector<1x32xf32>
    %c0_49 = arith.constant 0 : index
    %c0_50 = arith.constant 0 : index
    %61 = vector.load %arg11[%c0_49, %c0_50] : memref<32x128xf32, #tpu.memory_space<vmem>>, vector<32x128xf32>
    %cst_51 = arith.constant dense<0.000000e+00> : vector<1x128xf32>
    %62 = tpu.matmul %60, %61, %cst_51 {dimension_numbers = #tpu.dot_dimension_numbers<[1], [0], [0], [1], [0, 0, 1, 1], [], []>} : vector<1x32xf32>, vector<32x128xf32>, vector<1x128xf32> -> vector<1x128xf32>
    %63 = vector.broadcast %62 : vector<1x128xf32> to vector<2x128xf32>
    %64 = arith.mulf %49, %63 : vector<2x128xf32>
    %c0_52 = arith.constant 0 : index
    %c0_53 = arith.constant 0 : index
    %65 = vector.load %arg9[%c0_52, %c0_53] : memref<1x128xf32, #tpu.memory_space<vmem>>, vector<1x128xf32>
    %66 = vector.broadcast %65 : vector<1x128xf32> to vector<2x128xf32>
    %67 = arith.addf %64, %66 : vector<2x128xf32>
    %cst_54 = arith.constant 2.000000e-01 : f32
    %68 = vector.broadcast %cst_54 : f32 to vector<2x128xf32>
    %69 = arith.mulf %68, %67 : vector<2x128xf32>
    %70 = arith.maximumf %67, %69 : vector<2x128xf32>
    %c0_55 = arith.constant 0 : index
    %c0_56 = arith.constant 0 : index
    %71 = vector.load %arg12[%c0_55, %c0_56] : memref<128x64xf32, #tpu.memory_space<vmem>>, vector<128x64xf32>
    %cst_57 = arith.constant dense<0.000000e+00> : vector<2x64xf32>
    %72 = tpu.matmul %70, %71, %cst_57 {dimension_numbers = #tpu.dot_dimension_numbers<[1], [0], [0], [1], [0, 0, 1, 1], [], []>} : vector<2x128xf32>, vector<128x64xf32>, vector<2x64xf32> -> vector<2x64xf32>
    %cst_58 = arith.constant dense<0.000000e+00> : vector<1x64xf32>
    %73 = tpu.matmul %0, %72, %cst_58 {dimension_numbers = #tpu.dot_dimension_numbers<[1], [0], [0], [1], [0, 0, 1, 1], [], []>} : vector<1x2xf32>, vector<2x64xf32>, vector<1x64xf32> -> vector<1x64xf32>
    %c0_59 = arith.constant 0 : index
    %c0_60 = arith.constant 0 : index
    %74 = vector.load %arg15[%c0_59, %c0_60] : memref<64x64xf32, #tpu.memory_space<vmem>>, vector<64x64xf32>
    %cst_61 = arith.constant dense<0.000000e+00> : vector<1x64xf32>
    %75 = tpu.matmul %73, %74, %cst_61 {dimension_numbers = #tpu.dot_dimension_numbers<[1], [0], [0], [1], [0, 0, 1, 1], [], []>} : vector<1x64xf32>, vector<64x64xf32>, vector<1x64xf32> -> vector<1x64xf32>
    %cst_62 = arith.constant 5.000000e-01 : f32
    %76 = vector.broadcast %cst_62 : f32 to vector<1x64xf32>
    %77 = arith.mulf %75, %76 : vector<1x64xf32>
    %c0_63 = arith.constant 0 : index
    %c0_64 = arith.constant 0 : index
    %78 = vector.load %arg16[%c0_63, %c0_64] : memref<64x64xf32, #tpu.memory_space<vmem>>, vector<64x64xf32>
    %cst_65 = arith.constant dense<0.000000e+00> : vector<1x64xf32>
    %79 = tpu.matmul %77, %78, %cst_65 {dimension_numbers = #tpu.dot_dimension_numbers<[1], [0], [0], [1], [0, 0, 1, 1], [], []>} : vector<1x64xf32>, vector<64x64xf32>, vector<1x64xf32> -> vector<1x64xf32>
    %80 = vector.broadcast %79 : vector<1x64xf32> to vector<2x64xf32>
    %81 = arith.subf %72, %80 : vector<2x64xf32>
    %82 = arith.mulf %81, %81 : vector<2x64xf32>
    %cst_66 = arith.constant dense<0.000000e+00> : vector<1x64xf32>
    %83 = tpu.matmul %0, %82, %cst_66 {dimension_numbers = #tpu.dot_dimension_numbers<[1], [0], [0], [1], [0, 0, 1, 1], [], []>} : vector<1x2xf32>, vector<2x64xf32>, vector<1x64xf32> -> vector<1x64xf32>
    %c0_67 = arith.constant 0 : index
    %c0_68 = arith.constant 0 : index
    %84 = vector.load %arg15[%c0_67, %c0_68] : memref<64x64xf32, #tpu.memory_space<vmem>>, vector<64x64xf32>
    %cst_69 = arith.constant dense<0.000000e+00> : vector<1x64xf32>
    %85 = tpu.matmul %83, %84, %cst_69 {dimension_numbers = #tpu.dot_dimension_numbers<[1], [0], [0], [1], [0, 0, 1, 1], [], []>} : vector<1x64xf32>, vector<64x64xf32>, vector<1x64xf32> -> vector<1x64xf32>
    %cst_70 = arith.constant 5.000000e-01 : f32
    %86 = vector.broadcast %cst_70 : f32 to vector<1x64xf32>
    %87 = arith.mulf %85, %86 : vector<1x64xf32>
    %c0_71 = arith.constant 0 : index
    %c0_72 = arith.constant 0 : index
    %88 = vector.load %arg13[%c0_71, %c0_72] : memref<1x64xf32, #tpu.memory_space<vmem>>, vector<1x64xf32>
    %cst_73 = arith.constant 9.99999974E-6 : f32
    %89 = vector.broadcast %cst_73 : f32 to vector<1x64xf32>
    %90 = arith.addf %87, %89 : vector<1x64xf32>
    %91 = math.rsqrt %90 : vector<1x64xf32>
    %92 = arith.mulf %88, %91 : vector<1x64xf32>
    %c0_74 = arith.constant 0 : index
    %c0_75 = arith.constant 0 : index
    %93 = vector.load %arg16[%c0_74, %c0_75] : memref<64x64xf32, #tpu.memory_space<vmem>>, vector<64x64xf32>
    %cst_76 = arith.constant dense<0.000000e+00> : vector<1x64xf32>
    %94 = tpu.matmul %92, %93, %cst_76 {dimension_numbers = #tpu.dot_dimension_numbers<[1], [0], [0], [1], [0, 0, 1, 1], [], []>} : vector<1x64xf32>, vector<64x64xf32>, vector<1x64xf32> -> vector<1x64xf32>
    %95 = vector.broadcast %94 : vector<1x64xf32> to vector<2x64xf32>
    %96 = arith.mulf %81, %95 : vector<2x64xf32>
    %c0_77 = arith.constant 0 : index
    %c0_78 = arith.constant 0 : index
    %97 = vector.load %arg14[%c0_77, %c0_78] : memref<1x64xf32, #tpu.memory_space<vmem>>, vector<1x64xf32>
    %98 = vector.broadcast %97 : vector<1x64xf32> to vector<2x64xf32>
    %99 = arith.addf %96, %98 : vector<2x64xf32>
    %cst_79 = arith.constant 2.000000e-01 : f32
    %100 = vector.broadcast %cst_79 : f32 to vector<2x64xf32>
    %101 = arith.mulf %100, %99 : vector<2x64xf32>
    %102 = arith.maximumf %99, %101 : vector<2x64xf32>
    %c0_80 = arith.constant 0 : index
    %c0_81 = arith.constant 0 : index
    %103 = vector.load %arg17[%c0_80, %c0_81] : memref<64x32xf32, #tpu.memory_space<vmem>>, vector<64x32xf32>
    %cst_82 = arith.constant dense<0.000000e+00> : vector<2x32xf32>
    %104 = tpu.matmul %102, %103, %cst_82 {dimension_numbers = #tpu.dot_dimension_numbers<[1], [0], [0], [1], [0, 0, 1, 1], [], []>} : vector<2x64xf32>, vector<64x32xf32>, vector<2x32xf32> -> vector<2x32xf32>
    %c0_83 = arith.constant 0 : index
    %c0_84 = arith.constant 0 : index
    %105 = vector.load %arg18[%c0_83, %c0_84] : memref<1x32xf32, #tpu.memory_space<vmem>>, vector<1x32xf32>
    %106 = vector.broadcast %105 : vector<1x32xf32> to vector<2x32xf32>
    %107 = arith.addf %104, %106 : vector<2x32xf32>
    %c0_85 = arith.constant 0 : index
    %c0_86 = arith.constant 0 : index
    %108 = vector.load %arg19[%c0_85, %c0_86] : memref<2x32xf32, #tpu.memory_space<vmem>>, vector<2x32xf32>
    tpu.vector_store %arg19[%c0_85, %c0_86], %107 {strides = array<i32>} : memref<2x32xf32, #tpu.memory_space<vmem>>, vector<2x32xf32>,
    return
  }
}

</mosaic_0001>

<bundles_post_ra>
// kernel: encoder_forward.1
= control target key start
LH: loop header
LB: loop body
LE: loop exit
PB: predicated region body
PF: predicated region fallthrough
CT: control target
= control target key end

     0   :  { %s2380_s0 = inlined_call_operand.vmem [shape: f32[2,256], index: 0, kind: input, shape index: {}]   ;;  %s2381_s1 = inlined_call_operand.hbm [shape: f32[256,512], index: 1, kind: input, shape index: {}]   ;;  %s2382_s2 = inlined_call_operand.hbm [shape: f32[512,256], index: 2, kind: input, shape index: {}]   ;;  %s2383_s3 = inlined_call_operand.vmem [shape: f32[1,16], index: 3, kind: input, shape index: {}]   ;;  %s2384_s4 = inlined_call_operand.vmem [shape: f32[1,256], index: 4, kind: input, shape index: {}]   ;;  %s2385_s5 = inlined_call_operand.vmem [shape: f32[256,16], index: 5, kind: input, shape index: {}]   ;;  %s2386_s6 = inlined_call_operand.vmem [shape: f32[16,256], index: 6, kind: input, shape index: {}]   ;;  %s2387_s7 = inlined_call_operand.vmem [shape: f32[256,128], index: 7, kind: input, shape index: {}]   ;;  %s2388_s8 = inlined_call_operand.vmem [shape: f32[1,32], index: 8, kind: input, shape index: {}]   ;;  %s2389_s9 = inlined_call_operand.vmem [shape: f32[1,128], index: 9, kind: input, shape index: {}]   ;;  %s2390_s10 = inlined_call_operand.vmem [shape: f32[128,32], index: 10, kind: input, shape index: {}]   ;;  %s2391_s11 = inlined_call_operand.vmem [shape: f32[32,128], index: 11, kind: input, shape index: {}]   ;;  %s2392_s12 = inlined_call_operand.vmem [shape: f32[128,64], index: 12, kind: input, shape index: {}]   ;;  %s2393_s13 = inlined_call_operand.vmem [shape: f32[1,64], index: 13, kind: input, shape index: {}]   ;;  %s2394_s14 = inlined_call_operand.vmem [shape: f32[1,64], index: 14, kind: input, shape index: {}]   ;;  %s2395_s15 = inlined_call_operand.vmem [shape: f32[64,64], index: 15, kind: input, shape index: {}]   ;;  %s2396_s16 = inlined_call_operand.vmem [shape: f32[64,64], index: 16, kind: input, shape index: {}]   ;;  %s2397_s17 = inlined_call_operand.vmem [shape: f32[64,32], index: 17, kind: input, shape index: {}]   ;;  %s2398_s18 = inlined_call_operand.vmem [shape: f32[1,32], index: 18, kind: input, shape index: {}]   ;;  %s2399_s19 = inlined_call_operand.hbm [shape: f32[2,32], index: 19, kind: output, shape index: {}]  }
   0x1   :  { %2400 = sst [smem:[#allocation11_spill]] %s2380_s0 }
   0x2   :  { %2401 = sst [smem:[#allocation12_spill]] %s2381_s1 }
   0x3   :  { %2402 = sst [smem:[#allocation13_spill]] %s2382_s2 }
   0x4   :  { %2403 = sst [smem:[#allocation14_spill]] %s2383_s3 }
   0x5   :  { %2404 = sst [smem:[#allocation15_spill]] %s2399_s19 }
   0x6   :  { %24 = vsyncpa [#allocation3], 0 }
   0x7   :  { %25 = vsyncpa [#allocation6], 0 }
   0x8   :  { %26 = vsyncpa [#allocation4], 0  ;;  %s2405_s20 = sld [smem:[#allocation12_spill]]  ;;  %s1670_s1 = smov [#allocation2]  }
   0x9   :  { %s35_s22 = sshll.u32 %s1670_s1, 4  ;;  %s2406_s24 = sld [smem:[#allocation13_spill]]  ;;  %s36_s22 = int_to_ptr.vmem [resolvable:$true] %s35_s22 }
   0xa   :  { %s1671_s3 = smov 512   ;;  %s1672_s26 = smov 32  }
   0xb   :  { %s1673_s27 = smov [#allocation5]   ;;  %s1674_s29 = smov 256  }
   0xc   :  { %s48_s28 = sshll.u32 %s1673_s27, 4  ;;  %s1675_s19 = smov 16   ;;  %s49_s28 = int_to_ptr.vmem [resolvable:$true] %s48_s28 }
   0xe   :  { %s33_s21 = sshll.u32 %s2405_s20, 4  ;;  %s34_s21 = int_to_ptr.hbm [resolvable:$true] %s33_s21 }
   0xf   :  { %s46_s25 = sshll.u32 %s2406_s24, 4  ;;  %s47_s25 = int_to_ptr.hbm [resolvable:$true] %s46_s25 }
  0x10   :  { %41 = dma.hbm_to_vmem [thread:$0]  %s34_s21, 16384, %s36_s22, [#allocation3], %s1671_s3, %s1671_s3, %s1672_s26  }
  0x11   :  { %54 = dma.hbm_to_vmem [thread:$0]  %s47_s25, 16384, %s49_s28, [#allocation6], %s1674_s29, %s1674_s29, %s1675_s19  }
  0x12   :  { %1664 = dma.done.wait [#allocation3], 16384  }
  0x13   :  { %1665 = vsyncadd [#allocation3], 4294950912 }
  0x14   :  { %1666 = dma.done.wait [#allocation6], 16384  }
  0x15   :  { %1667 = vsyncadd [#allocation6], 4294950912  ;;  %v156_v0 = vld [vmem:[#allocation2 + $0x1e0] sm:$0xff]  ;;  %v157_v2 = vld [vmem:[#allocation2 + $0x1e8] sm:$0xff]  ;;  %s2407_s30 = sld [smem:[#allocation11_spill]]  ;;  %vm690_vm0 = vcmask 1041408  }
  0x16   :  { %v220_v1 = vld [vmem:[#allocation2 + $0x3e0] sm:$0xff]  ;;  %230 = vmatpush.msra.mxu0 %v156_v0  ;;  %v221_v3 = vld [vmem:[#allocation2 + $0x3e8] sm:$0xff]  ;;  %270 = vmatpush.msra.mxu2 %v157_v2  ;;  %v222_v2 = vld [vmem:[#allocation2 + $0x3f0] sm:$0xff]  ;;  %vm686_vm1 = vcmask 15360   ;;  %vm814_vm2 = vcmask 130048   ;;  %s2408_s29 = sld [smem:[#allocation14_spill]] }
  0x17   :  { %250 = vmatpush.msra.mxu1 %v220_v1  ;;  %v152_v4 = vld [vmem:[#allocation2 + $0x1c0] sm:$0xff]  ;;  %290 = vmatpush.msra.mxu3 %v221_v3  ;;  %v153_v6 = vld [vmem:[#allocation2 + $0x1c8] sm:$0xff]  ;;  %v158_v1 = vld [vmem:[#allocation2 + $0x1f0] sm:$0xff]  ;;  %vm1159_vm6 = vcmask 261120   ;;  %vm1342_vm10 = vcmask 523264   ;;  %vm1528_vm14 = vcmask 254976  }
  0x18   :  { %v216_v5 = vld [vmem:[#allocation2 + $0x3c0] sm:$0xff]  ;;  %v217_v7 = vld [vmem:[#allocation2 + $0x3c8] sm:$0xff]  ;;  %231 = vmatpush.msra.mxu0 %v152_v4  ;;  %271 = vmatpush.msra.mxu2 %v153_v6  ;;  %v159_v3 = vld [vmem:[#allocation2 + $0x1f8] sm:$0xff] }
  0x19   :  { %v148_v8 = vld [vmem:[#allocation2 + $0x1a0] sm:$0xff]  ;;  %251 = vmatpush.msra.mxu1 %v216_v5  ;;  %v149_v10 = vld [vmem:[#allocation2 + $0x1a8] sm:$0xff]  ;;  %291 = vmatpush.msra.mxu3 %v217_v7  ;;  %v223_v4 = vld [vmem:[#allocation2 + $0x3f8] sm:$0xff] }
  0x1a   :  { %v212_v9 = vld [vmem:[#allocation2 + $0x3a0] sm:$0xff]  ;;  %v213_v11 = vld [vmem:[#allocation2 + $0x3a8] sm:$0xff]  ;;  %232 = vmatpush.msra.mxu0 %v148_v8  ;;  %272 = vmatpush.msra.mxu2 %v149_v10  ;;  %v154_v5 = vld [vmem:[#allocation2 + $0x1d0] sm:$0xff] }
  0x1b   :  { %v144_v12 = vld [vmem:[#allocation2 + $0x180] sm:$0xff]  ;;  %252 = vmatpush.msra.mxu1 %v212_v9  ;;  %v145_v14 = vld [vmem:[#allocation2 + $0x188] sm:$0xff]  ;;  %292 = vmatpush.msra.mxu3 %v213_v11  ;;  %v95_v0 = vld [vmem:[%s2407_s30] sm:$0xf]  ;;  %s2409_s30 = sld [smem:[#allocation15_spill]] }
  0x1c   :  { %v208_v13 = vld [vmem:[#allocation2 + $0x380] sm:$0xff]  ;;  %v209_v15 = vld [vmem:[#allocation2 + $0x388] sm:$0xff]  ;;  %233 = vmatpush.msra.mxu0 %v144_v12  ;;  %273 = vmatpush.msra.mxu2 %v145_v14  ;;  %225 = vst [vmem:[#allocation1] ss:$4 sm:$0xff] %v95_v0  ;;  %v218_v6 = vld [vmem:[#allocation2 + $0x3d0] sm:$0xff] }
  0x1d   :  { %v140_v16 = vld [vmem:[#allocation2 + $0x160] sm:$0xff]  ;;  %253 = vmatpush.msra.mxu1 %v208_v13  ;;  %v141_v18 = vld [vmem:[#allocation2 + $0x168] sm:$0xff]  ;;  %293 = vmatpush.msra.mxu3 %v209_v15  ;;  %v155_v7 = vld [vmem:[#allocation2 + $0x1d8] sm:$0xff] }
  0x1e   :  { %v204_v17 = vld [vmem:[#allocation2 + $0x360] sm:$0xff]  ;;  %v205_v19 = vld [vmem:[#allocation2 + $0x368] sm:$0xff]  ;;  %234 = vmatpush.msra.mxu0 %v140_v16  ;;  %274 = vmatpush.msra.mxu2 %v141_v18  ;;  %v219_v8 = vld [vmem:[#allocation2 + $0x3d8] sm:$0xff] }
  0x1f   :  { %v136_v20 = vld [vmem:[#allocation2 + $0x140] sm:$0xff]  ;;  %254 = vmatpush.msra.mxu1 %v204_v17  ;;  %v137_v22 = vld [vmem:[#allocation2 + $0x148] sm:$0xff]  ;;  %294 = vmatpush.msra.mxu3 %v205_v19  ;;  %v150_v9 = vld [vmem:[#allocation2 + $0x1b0] sm:$0xff] }
  0x20   :  { %v200_v21 = vld [vmem:[#allocation2 + $0x340] sm:$0xff]  ;;  %v201_v23 = vld [vmem:[#allocation2 + $0x348] sm:$0xff]  ;;  %235 = vmatpush.msra.mxu0 %v136_v20  ;;  %275 = vmatpush.msra.mxu2 %v137_v22  ;;  %v214_v10 = vld [vmem:[#allocation2 + $0x3b0] sm:$0xff] }
  0x21   :  { %v132_v24 = vld [vmem:[#allocation2 + $0x120] sm:$0xff]  ;;  %255 = vmatpush.msra.mxu1 %v200_v21  ;;  %v133_v26 = vld [vmem:[#allocation2 + $0x128] sm:$0xff]  ;;  %295 = vmatpush.msra.mxu3 %v201_v23  ;;  %v151_v11 = vld [vmem:[#allocation2 + $0x1b8] sm:$0xff] }
  0x22   :  { %v196_v25 = vld [vmem:[#allocation2 + $0x320] sm:$0xff]  ;;  %v197_v27 = vld [vmem:[#allocation2 + $0x328] sm:$0xff]  ;;  %236 = vmatpush.msra.mxu0 %v132_v24  ;;  %276 = vmatpush.msra.mxu2 %v133_v26  ;;  %v215_v12 = vld [vmem:[#allocation2 + $0x3b8] sm:$0xff] }
  0x23   :  { %v128_v28 = vld [vmem:[#allocation2 + $0x100] sm:$0xff]  ;;  %256 = vmatpush.msra.mxu1 %v196_v25  ;;  %v129_v30 = vld [vmem:[#allocation2 + $0x108] sm:$0xff]  ;;  %296 = vmatpush.msra.mxu3 %v197_v27  ;;  %v146_v13 = vld [vmem:[#allocation2 + $0x190] sm:$0xff] }
  0x24   :  { %v192_v29 = vld [vmem:[#allocation2 + $0x300] sm:$0xff]  ;;  %v193_v31 = vld [vmem:[#allocation2 + $0x308] sm:$0xff]  ;;  %237 = vmatpush.msra.mxu0 %v128_v28  ;;  %277 = vmatpush.msra.mxu2 %v129_v30  ;;  %v210_v14 = vld [vmem:[#allocation2 + $0x390] sm:$0xff] }
  0x25   :  { %v124_v32 = vld [vmem:[#allocation2 + $0xe0] sm:$0xff]  ;;  %257 = vmatpush.msra.mxu1 %v192_v29  ;;  %v125_v34 = vld [vmem:[#allocation2 + $0xe8] sm:$0xff]  ;;  %297 = vmatpush.msra.mxu3 %v193_v31  ;;  %v147_v15 = vld [vmem:[#allocation2 + $0x198] sm:$0xff] }
  0x26   :  { %v188_v33 = vld [vmem:[#allocation2 + $0x2e0] sm:$0xff]  ;;  %v189_v35 = vld [vmem:[#allocation2 + $0x2e8] sm:$0xff]  ;;  %238 = vmatpush.msra.mxu0 %v124_v32  ;;  %278 = vmatpush.msra.mxu2 %v125_v34  ;;  %v211_v16 = vld [vmem:[#allocation2 + $0x398] sm:$0xff] }
  0x27   :  { %v120_v36 = vld [vmem:[#allocation2 + $0xc0] sm:$0xff]  ;;  %258 = vmatpush.msra.mxu1 %v188_v33  ;;  %v121_v38 = vld [vmem:[#allocation2 + $0xc8] sm:$0xff]  ;;  %298 = vmatpush.msra.mxu3 %v189_v35  ;;  %v142_v17 = vld [vmem:[#allocation2 + $0x170] sm:$0xff] }
  0x28   :  { %v184_v37 = vld [vmem:[#allocation2 + $0x2c0] sm:$0xff]  ;;  %v185_v39 = vld [vmem:[#allocation2 + $0x2c8] sm:$0xff]  ;;  %239 = vmatpush.msra.mxu0 %v120_v36  ;;  %279 = vmatpush.msra.mxu2 %v121_v38  ;;  %v206_v18 = vld [vmem:[#allocation2 + $0x370] sm:$0xff] }
  0x29   :  { %v116_v40 = vld [vmem:[#allocation2 + $0xa0] sm:$0xff]  ;;  %259 = vmatpush.msra.mxu1 %v184_v37  ;;  %v117_v42 = vld [vmem:[#allocation2 + $0xa8] sm:$0xff]  ;;  %299 = vmatpush.msra.mxu3 %v185_v39  ;;  %v143_v19 = vld [vmem:[#allocation2 + $0x178] sm:$0xff] }
  0x2a   :  { %v180_v41 = vld [vmem:[#allocation2 + $0x2a0] sm:$0xff]  ;;  %v181_v43 = vld [vmem:[#allocation2 + $0x2a8] sm:$0xff]  ;;  %240 = vmatpush.msra.mxu0 %v116_v40  ;;  %280 = vmatpush.msra.mxu2 %v117_v42  ;;  %v207_v20 = vld [vmem:[#allocation2 + $0x378] sm:$0xff] }
  0x2b   :  { %v112_v44 = vld [vmem:[#allocation2 + $0x80] sm:$0xff]  ;;  %260 = vmatpush.msra.mxu1 %v180_v41  ;;  %v113_v46 = vld [vmem:[#allocation2 + $0x88] sm:$0xff]  ;;  %300 = vmatpush.msra.mxu3 %v181_v43  ;;  %v138_v21 = vld [vmem:[#allocation2 + $0x150] sm:$0xff] }
  0x2c   :  { %v176_v45 = vld [vmem:[#allocation2 + $0x280] sm:$0xff]  ;;  %v177_v47 = vld [vmem:[#allocation2 + $0x288] sm:$0xff]  ;;  %241 = vmatpush.msra.mxu0 %v112_v44  ;;  %281 = vmatpush.msra.mxu2 %v113_v46  ;;  %v202_v22 = vld [vmem:[#allocation2 + $0x350] sm:$0xff] }
  0x2d   :  { %v108_v48 = vld [vmem:[#allocation2 + $0x60] sm:$0xff]  ;;  %261 = vmatpush.msra.mxu1 %v176_v45  ;;  %v109_v50 = vld [vmem:[#allocation2 + $0x68] sm:$0xff]  ;;  %301 = vmatpush.msra.mxu3 %v177_v47  ;;  %v139_v23 = vld [vmem:[#allocation2 + $0x158] sm:$0xff] }
  0x2e   :  { %v172_v49 = vld [vmem:[#allocation2 + $0x260] sm:$0xff]  ;;  %v173_v51 = vld [vmem:[#allocation2 + $0x268] sm:$0xff]  ;;  %242 = vmatpush.msra.mxu0 %v108_v48  ;;  %282 = vmatpush.msra.mxu2 %v109_v50  ;;  %v203_v24 = vld [vmem:[#allocation2 + $0x358] sm:$0xff] }
  0x2f   :  { %v104_v52 = vld [vmem:[#allocation2 + $0x40] sm:$0xff]  ;;  %262 = vmatpush.msra.mxu1 %v172_v49  ;;  %v105_v54 = vld [vmem:[#allocation2 + $0x48] sm:$0xff]  ;;  %302 = vmatpush.msra.mxu3 %v173_v51  ;;  %v1787_v25 = vld.sshfl [vmem:[#allocation1] sm:$0xff pattern:$0x73625140] }
  0x30   :  { %v168_v53 = vld [vmem:[#allocation2 + $0x240] sm:$0xff]  ;;  %v169_v55 = vld [vmem:[#allocation2 + $0x248] sm:$0xff]  ;;  %243 = vmatpush.msra.mxu0 %v104_v52  ;;  %283 = vmatpush.msra.mxu2 %v105_v54  ;;  %v134_v27 = vld [vmem:[#allocation2 + $0x130] sm:$0xff] }
  0x31   :  { %v100_v56 = vld [vmem:[#allocation2 + $0x20] sm:$0xff]  ;;  %263 = vmatpush.msra.mxu1 %v168_v53  ;;  %v101_v58 = vld [vmem:[#allocation2 + $0x28] sm:$0xff]  ;;  %303 = vmatpush.msra.mxu3 %v169_v55  ;;  %v198_v28 = vld [vmem:[#allocation2 + $0x330] sm:$0xff] }
  0x32   :  { %v164_v57 = vld [vmem:[#allocation2 + $0x220] sm:$0xff]  ;;  %v165_v59 = vld [vmem:[#allocation2 + $0x228] sm:$0xff]  ;;  %244 = vmatpush.msra.mxu0 %v100_v56  ;;  %284 = vmatpush.msra.mxu2 %v101_v58  ;;  %v135_v29 = vld [vmem:[#allocation2 + $0x138] sm:$0xff] }
  0x33   :  { %v96_v60 = vld [vmem:[#allocation2] sm:$0xff]  ;;  %264 = vmatpush.msra.mxu1 %v164_v57  ;;  %v97_v62 = vld [vmem:[#allocation2 + $0x8] sm:$0xff]  ;;  %304 = vmatpush.msra.mxu3 %v165_v59  ;;  %v199_v30 = vld [vmem:[#allocation2 + $0x338] sm:$0xff] }
  0x34   :  { %v160_v61 = vld [vmem:[#allocation2 + $0x200] sm:$0xff]  ;;  %v161_v63 = vld [vmem:[#allocation2 + $0x208] sm:$0xff]  ;;  %245 = vmatpush.msra.mxu0 %v96_v60  ;;  %285 = vmatpush.msra.mxu2 %v97_v62  ;;  %v130_v31 = vld [vmem:[#allocation2 + $0x110] sm:$0xff] }
  0x35   :  { %265 = vmatpush.msra.mxu1 %v160_v61  ;;  %305 = vmatpush.msra.mxu3 %v161_v63  ;;  %v1789_v26 = vld.sshfl [vmem:[#allocation1 + $0x8] sm:$0xff pattern:$0x73625140]  ;;  %v194_v32 = vld [vmem:[#allocation2 + $0x310] sm:$0xff]  ;;  %v131_v33 = vld [vmem:[#allocation2 + $0x118] sm:$0xff] }
  0x36   :  { %310 = vmatpush.msrb.mxu0 %v158_v1  ;;  %350 = vmatpush.msrb.mxu2 %v159_v3  ;;  %v195_v34 = vld [vmem:[#allocation2 + $0x318] sm:$0xff]  ;;  %v126_v35 = vld [vmem:[#allocation2 + $0xf0] sm:$0xff] }
  0x37   :  { %330 = vmatpush.msrb.mxu1 %v222_v2  ;;  %370 = vmatpush.msrb.mxu3 %v223_v4  ;;  %v190_v36 = vld [vmem:[#allocation2 + $0x2f0] sm:$0xff]  ;;  %v127_v37 = vld [vmem:[#allocation2 + $0xf8] sm:$0xff] }
  0x38   :  { %311 = vmatpush.msrb.mxu0 %v154_v5  ;;  %351 = vmatpush.msrb.mxu2 %v155_v7  ;;  %v191_v38 = vld [vmem:[#allocation2 + $0x2f8] sm:$0xff]  ;;  %v122_v39 = vld [vmem:[#allocation2 + $0xd0] sm:$0xff]  ;;  %v426_v7 = vld [vmem:[#allocation5 + $0xe0] sm:$0xff] }
  0x39   :  { %331 = vmatpush.msrb.mxu1 %v218_v6  ;;  %371 = vmatpush.msrb.mxu3 %v219_v8  ;;  %v186_v40 = vld [vmem:[#allocation2 + $0x2d0] sm:$0xff]  ;;  %v123_v41 = vld [vmem:[#allocation2 + $0xd8] sm:$0xff]  ;;  %v458_v8 = vld [vmem:[#allocation5 + $0x1e0] sm:$0xff] }
  0x3a   :  { %312 = vmatpush.msrb.mxu0 %v150_v9  ;;  %352 = vmatpush.msrb.mxu2 %v151_v11  ;;  %v187_v42 = vld [vmem:[#allocation2 + $0x2d8] sm:$0xff]  ;;  %v118_v43 = vld [vmem:[#allocation2 + $0xb0] sm:$0xff]  ;;  %v490_v9 = vld [vmem:[#allocation5 + $0x2e0] sm:$0xff] }
  0x3b   :  { %332 = vmatpush.msrb.mxu1 %v214_v10  ;;  %372 = vmatpush.msrb.mxu3 %v215_v12  ;;  %v182_v44 = vld [vmem:[#allocation2 + $0x2b0] sm:$0xff]  ;;  %v119_v45 = vld [vmem:[#allocation2 + $0xb8] sm:$0xff]  ;;  %v522_v10 = vld [vmem:[#allocation5 + $0x3e0] sm:$0xff] }
  0x3c   :  { %313 = vmatpush.msrb.mxu0 %v146_v13  ;;  %353 = vmatpush.msrb.mxu2 %v147_v15  ;;  %v183_v46 = vld [vmem:[#allocation2 + $0x2b8] sm:$0xff]  ;;  %v114_v47 = vld [vmem:[#allocation2 + $0x90] sm:$0xff]  ;;  %v422_v15 = vld [vmem:[#allocation5 + $0xc0] sm:$0xff] }
  0x3d   :  { %333 = vmatpush.msrb.mxu1 %v210_v14  ;;  %373 = vmatpush.msrb.mxu3 %v211_v16  ;;  %v178_v48 = vld [vmem:[#allocation2 + $0x290] sm:$0xff]  ;;  %v115_v49 = vld [vmem:[#allocation2 + $0x98] sm:$0xff]  ;;  %v454_v16 = vld [vmem:[#allocation5 + $0x1c0] sm:$0xff] }
  0x3e   :  { %314 = vmatpush.msrb.mxu0 %v142_v17  ;;  %354 = vmatpush.msrb.mxu2 %v143_v19  ;;  %v179_v50 = vld [vmem:[#allocation2 + $0x298] sm:$0xff]  ;;  %v110_v51 = vld [vmem:[#allocation2 + $0x70] sm:$0xff]  ;;  %v486_v17 = vld [vmem:[#allocation5 + $0x2c0] sm:$0xff] }
  0x3f   :  { %334 = vmatpush.msrb.mxu1 %v206_v18  ;;  %374 = vmatpush.msrb.mxu3 %v207_v20  ;;  %v174_v52 = vld [vmem:[#allocation2 + $0x270] sm:$0xff]  ;;  %v111_v53 = vld [vmem:[#allocation2 + $0x78] sm:$0xff]  ;;  %v518_v18 = vld [vmem:[#allocation5 + $0x3c0] sm:$0xff] }
  0x40   :  { %315 = vmatpush.msrb.mxu0 %v138_v21  ;;  %355 = vmatpush.msrb.mxu2 %v139_v23  ;;  %v175_v54 = vld [vmem:[#allocation2 + $0x278] sm:$0xff]  ;;  %v106_v55 = vld [vmem:[#allocation2 + $0x50] sm:$0xff]  ;;  %v418_v23 = vld [vmem:[#allocation5 + $0xa0] sm:$0xff] }
  0x41   :  { %335 = vmatpush.msrb.mxu1 %v202_v22  ;;  %375 = vmatpush.msrb.mxu3 %v203_v24  ;;  %v170_v56 = vld [vmem:[#allocation2 + $0x250] sm:$0xff]  ;;  %v107_v57 = vld [vmem:[#allocation2 + $0x58] sm:$0xff]  ;;  %v450_v24 = vld [vmem:[#allocation5 + $0x1a0] sm:$0xff] }
  0x42   :  { %286 = vmatmul.f32.vlgmr.msra.gmra.mxu2 %v1787_v25  ;;  %306 = vmatmul.f32.vlgmr.msra.gmra.mxu3 %v1789_v26  ;;  %v171_v58 = vld [vmem:[#allocation2 + $0x258] sm:$0xff]  ;;  %v102_v59 = vld [vmem:[#allocation2 + $0x30] sm:$0xff] }
  0x43   :  { %316 = vmatpush.msrb.mxu0 %v134_v27  ;;  %336 = vmatpush.msrb.mxu1 %v198_v28  ;;  %v166_v60 = vld [vmem:[#allocation2 + $0x230] sm:$0xff]  ;;  %v103_v61 = vld [vmem:[#allocation2 + $0x38] sm:$0xff] }
  0x44   :  { %356 = vmatpush.msrb.mxu2 %v135_v29  ;;  %376 = vmatpush.msrb.mxu3 %v199_v30  ;;  %v167_v62 = vld [vmem:[#allocation2 + $0x238] sm:$0xff]  ;;  %v98_v63 = vld [vmem:[#allocation2 + $0x10] sm:$0xff] }
  0x45   :  { %317 = vmatpush.msrb.mxu0 %v130_v31  ;;  %337 = vmatpush.msrb.mxu1 %v194_v32  ;;  %v162_v0 = vld [vmem:[#allocation2 + $0x210] sm:$0xff]  ;;  %v99_v1 = vld [vmem:[#allocation2 + $0x18] sm:$0xff]  ;;  %v414_v31 = vld [vmem:[#allocation5 + $0x80] sm:$0xff] }
  0x46   :  { %357 = vmatpush.msrb.mxu2 %v131_v33  ;;  %377 = vmatpush.msrb.mxu3 %v195_v34  ;;  %v163_v2 = vld [vmem:[#allocation2 + $0x218] sm:$0xff]  ;;  %v428_v3 = vld [vmem:[#allocation5 + $0xf0] sm:$0xff]  ;;  %v446_v32 = vld [vmem:[#allocation5 + $0x180] sm:$0xff] }
  0x47   :  { %318 = vmatpush.msrb.mxu0 %v126_v35  ;;  %338 = vmatpush.msrb.mxu1 %v190_v36  ;;  %v460_v4 = vld [vmem:[#allocation5 + $0x1f0] sm:$0xff]  ;;  %v478_v33 = vld [vmem:[#allocation5 + $0x280] sm:$0xff] }
  0x48   :  { %358 = vmatpush.msrb.mxu2 %v127_v37  ;;  %378 = vmatpush.msrb.mxu3 %v191_v38  ;;  %v492_v5 = vld [vmem:[#allocation5 + $0x2f0] sm:$0xff]  ;;  %v510_v34 = vld [vmem:[#allocation5 + $0x380] sm:$0xff] }
  0x49   :  { %246 = vmatmul.f32.vlgmr.msra.gmra.mxu0 %v1787_v25  ;;  %266 = vmatmul.f32.vlgmr.msra.gmra.mxu1 %v1789_v26  ;;  %v524_v6 = vld [vmem:[#allocation5 + $0x3f0] sm:$0xff] }
  0x4a   :  { %319 = vmatpush.msrb.mxu0 %v122_v39  ;;  %339 = vmatpush.msrb.mxu1 %v186_v40  ;;  %v424_v11 = vld [vmem:[#allocation5 + $0xd0] sm:$0xff]  ;;  %v410_v39 = vld [vmem:[#allocation5 + $0x60] sm:$0xff] }
  0x4b   :  { %359 = vmatpush.msrb.mxu2 %v123_v41  ;;  %379 = vmatpush.msrb.mxu3 %v187_v42  ;;  %v456_v12 = vld [vmem:[#allocation5 + $0x1d0] sm:$0xff]  ;;  %v442_v40 = vld [vmem:[#allocation5 + $0x160] sm:$0xff] }
  0x4c   :  { %320 = vmatpush.msrb.mxu0 %v118_v43  ;;  %340 = vmatpush.msrb.mxu1 %v182_v44  ;;  %v488_v13 = vld [vmem:[#allocation5 + $0x2d0] sm:$0xff]  ;;  %v474_v41 = vld [vmem:[#allocation5 + $0x260] sm:$0xff] }
  0x4d   :  { %360 = vmatpush.msrb.mxu2 %v119_v45  ;;  %380 = vmatpush.msrb.mxu3 %v183_v46  ;;  %v520_v14 = vld [vmem:[#allocation5 + $0x3d0] sm:$0xff]  ;;  %v506_v42 = vld [vmem:[#allocation5 + $0x360] sm:$0xff] }
  0x4e   :  { %321 = vmatpush.msrb.mxu0 %v114_v47  ;;  %341 = vmatpush.msrb.mxu1 %v178_v48  ;;  %v420_v19 = vld [vmem:[#allocation5 + $0xb0] sm:$0xff]  ;;  %v406_v47 = vld [vmem:[#allocation5 + $0x40] sm:$0xff] }
  0x4f   :  { %361 = vmatpush.msrb.mxu2 %v115_v49  ;;  %381 = vmatpush.msrb.mxu3 %v179_v50  ;;  %v452_v20 = vld [vmem:[#allocation5 + $0x1b0] sm:$0xff]  ;;  %v438_v48 = vld [vmem:[#allocation5 + $0x140] sm:$0xff] }
  0x50   :  { %322 = vmatpush.msrb.mxu0 %v110_v51  ;;  %342 = vmatpush.msrb.mxu1 %v174_v52  ;;  %v484_v21 = vld [vmem:[#allocation5 + $0x2b0] sm:$0xff]  ;;  %v470_v49 = vld [vmem:[#allocation5 + $0x240] sm:$0xff] }
  0x51   :  { %362 = vmatpush.msrb.mxu2 %v111_v53  ;;  %382 = vmatpush.msrb.mxu3 %v175_v54  ;;  %v516_v22 = vld [vmem:[#allocation5 + $0x3b0] sm:$0xff]  ;;  %v502_v50 = vld [vmem:[#allocation5 + $0x340] sm:$0xff] }
  0x52   :  { %323 = vmatpush.msrb.mxu0 %v106_v55  ;;  %343 = vmatpush.msrb.mxu1 %v170_v56  ;;  %v416_v27 = vld [vmem:[#allocation5 + $0x90] sm:$0xff]  ;;  %v402_v55 = vld [vmem:[#allocation5 + $0x20] sm:$0xff] }
  0x53   :  { %363 = vmatpush.msrb.mxu2 %v107_v57  ;;  %383 = vmatpush.msrb.mxu3 %v171_v58  ;;  %v448_v28 = vld [vmem:[#allocation5 + $0x190] sm:$0xff]  ;;  %v434_v56 = vld [vmem:[#allocation5 + $0x120] sm:$0xff] }
  0x54   :  { %324 = vmatpush.msrb.mxu0 %v102_v59  ;;  %344 = vmatpush.msrb.mxu1 %v166_v60  ;;  %v480_v29 = vld [vmem:[#allocation5 + $0x290] sm:$0xff]  ;;  %v466_v57 = vld [vmem:[#allocation5 + $0x220] sm:$0xff] }
  0x55   :  { %364 = vmatpush.msrb.mxu2 %v103_v61  ;;  %384 = vmatpush.msrb.mxu3 %v167_v62  ;;  %v512_v30 = vld [vmem:[#allocation5 + $0x390] sm:$0xff]  ;;  %v498_v58 = vld [vmem:[#allocation5 + $0x320] sm:$0xff] }
  0x56   :  { %325 = vmatpush.msrb.mxu0 %v98_v63  ;;  %345 = vmatpush.msrb.mxu1 %v162_v0  ;;  %v412_v35 = vld [vmem:[#allocation5 + $0x70] sm:$0xff]  ;;  %v398_v62 = vld [vmem:[#allocation5] sm:$0xff]  ;;  %v429_v0 = vld [vmem:[#allocation5 + $0xf8] sm:$0xff] }
  0x57   :  { %365 = vmatpush.msrb.mxu2 %v99_v1  ;;  %385 = vmatpush.msrb.mxu3 %v163_v2  ;;  %v444_v36 = vld [vmem:[#allocation5 + $0x170] sm:$0xff]  ;;  %v430_v63 = vld [vmem:[#allocation5 + $0x100] sm:$0xff]  ;;  %v461_v1 = vld [vmem:[#allocation5 + $0x1f8] sm:$0xff] }
  0x58   :  { %326 = vmatmul.f32.vlgmr.msrb.gmra.mxu0 %v1787_v25  ;;  %346 = vmatmul.f32.vlgmr.msrb.gmra.mxu1 %v1789_v26  ;;  %v476_v37 = vld [vmem:[#allocation5 + $0x270] sm:$0xff]  ;;  %v462_v2 = vld [vmem:[#allocation5 + $0x200] sm:$0xff] }
  0x59   :  { %366 = vmatmul.f32.vlgmr.msrb.gmra.mxu2 %v1787_v25  ;;  %386 = vmatmul.f32.vlgmr.msrb.gmra.mxu3 %v1789_v26  ;;  %v482_v25 = vld [vmem:[#allocation5 + $0x2a0] sm:$0xff]  ;;  %v508_v38 = vld [vmem:[#allocation5 + $0x370] sm:$0xff] }
  0x5a   :  { %526 = vmatpush.msra.mxu0 %v428_v3  ;;  %546 = vmatpush.msra.mxu1 %v460_v4  ;;  %v514_v26 = vld [vmem:[#allocation5 + $0x3a0] sm:$0xff]  ;;  %v408_v43 = vld [vmem:[#allocation5 + $0x50] sm:$0xff]  ;;  %v427_v3 = vld [vmem:[#allocation5 + $0xe8] sm:$0xff] }
  0x5b   :  { %566 = vmatpush.msra.mxu2 %v492_v5  ;;  %586 = vmatpush.msra.mxu3 %v524_v6  ;;  %v440_v44 = vld [vmem:[#allocation5 + $0x150] sm:$0xff]  ;;  %v459_v4 = vld [vmem:[#allocation5 + $0x1e8] sm:$0xff]  ;;  %v493_v5 = vld [vmem:[#allocation5 + $0x2f8] sm:$0xff] }
  0x5c   :  { %527 = vmatpush.msra.mxu0 %v426_v7  ;;  %547 = vmatpush.msra.mxu1 %v458_v8  ;;  %v472_v45 = vld [vmem:[#allocation5 + $0x250] sm:$0xff]  ;;  %v425_v6 = vld [vmem:[#allocation5 + $0xd8] sm:$0xff]  ;;  %v423_v8 = vld [vmem:[#allocation5 + $0xc8] sm:$0xff] }
  0x5d   :  { %567 = vmatpush.msra.mxu2 %v490_v9  ;;  %587 = vmatpush.msra.mxu3 %v522_v10  ;;  %v504_v46 = vld [vmem:[#allocation5 + $0x350] sm:$0xff]  ;;  %v457_v7 = vld [vmem:[#allocation5 + $0x1d8] sm:$0xff]  ;;  %v455_v9 = vld [vmem:[#allocation5 + $0x1c8] sm:$0xff] }
  0x5e   :  { %528 = vmatpush.msra.mxu0 %v424_v11  ;;  %548 = vmatpush.msra.mxu1 %v456_v12  ;;  %v404_v51 = vld [vmem:[#allocation5 + $0x30] sm:$0xff]  ;;  %v421_v10 = vld [vmem:[#allocation5 + $0xb8] sm:$0xff]  ;;  %v419_v12 = vld [vmem:[#allocation5 + $0xa8] sm:$0xff] }
  0x5f   :  { %568 = vmatpush.msra.mxu2 %v488_v13  ;;  %588 = vmatpush.msra.mxu3 %v520_v14  ;;  %v436_v52 = vld [vmem:[#allocation5 + $0x130] sm:$0xff]  ;;  %v453_v11 = vld [vmem:[#allocation5 + $0x1b8] sm:$0xff]  ;;  %v451_v13 = vld [vmem:[#allocation5 + $0x1a8] sm:$0xff] }
  0x60   :  { %529 = vmatpush.msra.mxu0 %v422_v15  ;;  %549 = vmatpush.msra.mxu1 %v454_v16  ;;  %v468_v53 = vld [vmem:[#allocation5 + $0x230] sm:$0xff]  ;;  %v417_v14 = vld [vmem:[#allocation5 + $0x98] sm:$0xff]  ;;  %v415_v16 = vld [vmem:[#allocation5 + $0x88] sm:$0xff] }
  0x61   :  { %569 = vmatpush.msra.mxu2 %v486_v17  ;;  %589 = vmatpush.msra.mxu3 %v518_v18  ;;  %v500_v54 = vld [vmem:[#allocation5 + $0x330] sm:$0xff]  ;;  %v449_v15 = vld [vmem:[#allocation5 + $0x198] sm:$0xff]  ;;  %v447_v17 = vld [vmem:[#allocation5 + $0x188] sm:$0xff] }
  0x62   :  { %530 = vmatpush.msra.mxu0 %v420_v19  ;;  %550 = vmatpush.msra.mxu1 %v452_v20  ;;  %v400_v59 = vld [vmem:[#allocation5 + $0x10] sm:$0xff]  ;;  %v413_v18 = vld [vmem:[#allocation5 + $0x78] sm:$0xff]  ;;  %v491_v20 = vld [vmem:[#allocation5 + $0x2e8] sm:$0xff] }
  0x63   :  { %570 = vmatpush.msra.mxu2 %v484_v21  ;;  %590 = vmatpush.msra.mxu3 %v516_v22  ;;  %v432_v60 = vld [vmem:[#allocation5 + $0x110] sm:$0xff]  ;;  %v445_v19 = vld [vmem:[#allocation5 + $0x178] sm:$0xff]  ;;  %v411_v22 = vld [vmem:[#allocation5 + $0x68] sm:$0xff] }
  0x64   :  { %531 = vmatpush.msra.mxu0 %v418_v23  ;;  %551 = vmatpush.msra.mxu1 %v450_v24  ;;  %v464_v61 = vld [vmem:[#allocation5 + $0x210] sm:$0xff]  ;;  %v443_v23 = vld [vmem:[#allocation5 + $0x168] sm:$0xff]  ;;  %v489_v24 = vld [vmem:[#allocation5 + $0x2d8] sm:$0xff] }
  0x65   :  { %571 = vmatpush.msra.mxu2 %v482_v25  ;;  %591 = vmatpush.msra.mxu3 %v514_v26  ;;  %v496_v21 = vld [vmem:[#allocation5 + $0x310] sm:$0xff]  ;;  %v494_v25 = vld [vmem:[#allocation5 + $0x300] sm:$0xff]  ;;  %v409_v26 = vld [vmem:[#allocation5 + $0x58] sm:$0xff] }
  0x66   :  { %532 = vmatpush.msra.mxu0 %v416_v27  ;;  %552 = vmatpush.msra.mxu1 %v448_v28  ;;  %v441_v27 = vld [vmem:[#allocation5 + $0x158] sm:$0xff]  ;;  %v487_v28 = vld [vmem:[#allocation5 + $0x2c8] sm:$0xff] }
  0x67   :  { %572 = vmatpush.msra.mxu2 %v480_v29  ;;  %592 = vmatpush.msra.mxu3 %v512_v30  ;;  %v525_v29 = vld [vmem:[#allocation5 + $0x3f8] sm:$0xff]  ;;  %v407_v30 = vld [vmem:[#allocation5 + $0x48] sm:$0xff] }
  0x68   :  { %533 = vmatpush.msra.mxu0 %v414_v31  ;;  %553 = vmatpush.msra.mxu1 %v446_v32  ;;  %v439_v31 = vld [vmem:[#allocation5 + $0x148] sm:$0xff]  ;;  %v485_v32 = vld [vmem:[#allocation5 + $0x2b8] sm:$0xff] }
  0x69   :  { %573 = vmatpush.msra.mxu2 %v478_v33  ;;  %593 = vmatpush.msra.mxu3 %v510_v34  ;;  %v523_v33 = vld [vmem:[#allocation5 + $0x3e8] sm:$0xff]  ;;  %v405_v34 = vld [vmem:[#allocation5 + $0x38] sm:$0xff] }
  0x6a   :  { %534 = vmatpush.msra.mxu0 %v412_v35  ;;  %554 = vmatpush.msra.mxu1 %v444_v36  ;;  %v437_v35 = vld [vmem:[#allocation5 + $0x138] sm:$0xff]  ;;  %v483_v36 = vld [vmem:[#allocation5 + $0x2a8] sm:$0xff] }
  0x6b   :  { %574 = vmatpush.msra.mxu2 %v476_v37  ;;  %594 = vmatpush.msra.mxu3 %v508_v38  ;;  %v521_v37 = vld [vmem:[#allocation5 + $0x3d8] sm:$0xff]  ;;  %v403_v38 = vld [vmem:[#allocation5 + $0x28] sm:$0xff] }
  0x6c   :  { %535 = vmatpush.msra.mxu0 %v410_v39  ;;  %555 = vmatpush.msra.mxu1 %v442_v40  ;;  %v435_v39 = vld [vmem:[#allocation5 + $0x128] sm:$0xff]  ;;  %v481_v40 = vld [vmem:[#allocation5 + $0x298] sm:$0xff] }
  0x6d   :  { %575 = vmatpush.msra.mxu2 %v474_v41  ;;  %595 = vmatpush.msra.mxu3 %v506_v42  ;;  %v519_v41 = vld [vmem:[#allocation5 + $0x3c8] sm:$0xff]  ;;  %v401_v42 = vld [vmem:[#allocation5 + $0x18] sm:$0xff] }
  0x6e   :  { %536 = vmatpush.msra.mxu0 %v408_v43  ;;  %556 = vmatpush.msra.mxu1 %v440_v44  ;;  %v433_v43 = vld [vmem:[#allocation5 + $0x118] sm:$0xff]  ;;  %v479_v44 = vld [vmem:[#allocation5 + $0x288] sm:$0xff] }
  0x6f   :  { %576 = vmatpush.msra.mxu2 %v472_v45  ;;  %596 = vmatpush.msra.mxu3 %v504_v46  ;;  %v517_v45 = vld [vmem:[#allocation5 + $0x3b8] sm:$0xff]  ;;  %v399_v46 = vld [vmem:[#allocation5 + $0x8] sm:$0xff] }
  0x70   :  { %537 = vmatpush.msra.mxu0 %v406_v47  ;;  %557 = vmatpush.msra.mxu1 %v438_v48  ;;  %v431_v47 = vld [vmem:[#allocation5 + $0x108] sm:$0xff]  ;;  %v477_v48 = vld [vmem:[#allocation5 + $0x278] sm:$0xff] }
  0x71   :  { %577 = vmatpush.msra.mxu2 %v470_v49  ;;  %597 = vmatpush.msra.mxu3 %v502_v50  ;;  %v515_v49 = vld [vmem:[#allocation5 + $0x3a8] sm:$0xff] }
  0x72   :  { %538 = vmatpush.msra.mxu0 %v404_v51  ;;  %558 = vmatpush.msra.mxu1 %v436_v52  ;;  %v475_v50 = vld [vmem:[#allocation5 + $0x268] sm:$0xff]  ;;  %v513_v51 = vld [vmem:[#allocation5 + $0x398] sm:$0xff] }
  0x73   :  { %578 = vmatpush.msra.mxu2 %v468_v53  ;;  %598 = vmatpush.msra.mxu3 %v500_v54  ;;  %v473_v52 = vld [vmem:[#allocation5 + $0x258] sm:$0xff]  ;;  %v511_v53 = vld [vmem:[#allocation5 + $0x388] sm:$0xff] }
  0x74   :  { %539 = vmatpush.msra.mxu0 %v402_v55  ;;  %559 = vmatpush.msra.mxu1 %v434_v56  ;;  %v471_v54 = vld [vmem:[#allocation5 + $0x248] sm:$0xff]  ;;  %v509_v55 = vld [vmem:[#allocation5 + $0x378] sm:$0xff] }
  0x75   :  { %579 = vmatpush.msra.mxu2 %v466_v57  ;;  %599 = vmatpush.msra.mxu3 %v498_v58  ;;  %v469_v56 = vld [vmem:[#allocation5 + $0x238] sm:$0xff]  ;;  %v507_v57 = vld [vmem:[#allocation5 + $0x368] sm:$0xff] }
  0x76   :  { %540 = vmatpush.msra.mxu0 %v400_v59  ;;  %560 = vmatpush.msra.mxu1 %v432_v60  ;;  %v467_v58 = vld [vmem:[#allocation5 + $0x228] sm:$0xff]  ;;  %v505_v59 = vld [vmem:[#allocation5 + $0x358] sm:$0xff] }
  0x77   :  { %580 = vmatpush.msra.mxu2 %v464_v61  ;;  %600 = vmatpush.msra.mxu3 %v496_v21  ;;  %v465_v60 = vld [vmem:[#allocation5 + $0x218] sm:$0xff]  ;;  %v503_v61 = vld [vmem:[#allocation5 + $0x348] sm:$0xff] }
  0x78   :  { %541 = vmatpush.msra.mxu0 %v398_v62  ;;  %561 = vmatpush.msra.mxu1 %v430_v63  ;;  %v463_v62 = vld [vmem:[#allocation5 + $0x208] sm:$0xff]  ;;  %v501_v63 = vld [vmem:[#allocation5 + $0x338] sm:$0xff] }
  0x79   :  { %581 = vmatpush.msra.mxu2 %v462_v2  ;;  %601 = vmatpush.msra.mxu3 %v494_v25  ;;  %v1813_v25 = vld [vmem:[%s2385_s5 + $0xf8] sm:$0xff] }
  0x7a   :  { %606 = vmatpush.msrb.mxu0 %v429_v0  ;;  %626 = vmatpush.msrb.mxu1 %v461_v1  ;;  %v499_v0 = vld [vmem:[#allocation5 + $0x328] sm:$0xff] }
  0x7b   :  { %646 = vmatpush.msrb.mxu2 %v493_v5  ;;  %666 = vmatpush.msrb.mxu3 %v525_v29  ;;  %v1835_v29 = vld [vmem:[%s2385_s5 + $0x60] sm:$0xff] }
  0x7c   :  { %607 = vmatpush.msrb.mxu0 %v427_v3  ;;  %627 = vmatpush.msrb.mxu1 %v459_v4 }
  0x7d   :  { %647 = vmatpush.msrb.mxu2 %v491_v20  ;;  %667 = vmatpush.msrb.mxu3 %v523_v33  ;;  %v1859_v33 = vld [vmem:[%s2385_s5 + $0x50] sm:$0xff] }
  0x7e   :  { %608 = vmatpush.msrb.mxu0 %v425_v6  ;;  %628 = vmatpush.msrb.mxu1 %v457_v7  ;;  %v497_v6 = vld [vmem:[#allocation5 + $0x318] sm:$0xff] }
  0x7f   :  { %648 = vmatpush.msrb.mxu2 %v489_v24  ;;  %668 = vmatpush.msrb.mxu3 %v521_v37  ;;  %v1807_v24 = vld [vmem:[%s2385_s5 + $0x70] sm:$0xff] }
  0x80   :  { %609 = vmatpush.msrb.mxu0 %v423_v8  ;;  %629 = vmatpush.msrb.mxu1 %v455_v9  ;;  %v495_v9 = vld [vmem:[#allocation5 + $0x308] sm:$0xff] }
  0x81   :  { %649 = vmatpush.msrb.mxu2 %v487_v28  ;;  %669 = vmatpush.msrb.mxu3 %v519_v41  ;;  %v1830_v28 = vld [vmem:[%s2385_s5 + $0xe8] sm:$0xff] }
  0x82   :  { %610 = vmatpush.msrb.mxu0 %v421_v10  ;;  %630 = vmatpush.msrb.mxu1 %v453_v11 }
  0x83   :  { %650 = vmatpush.msrb.mxu2 %v485_v32  ;;  %670 = vmatpush.msrb.mxu3 %v517_v45  ;;  %v1854_v32 = vld [vmem:[%s2385_s5 + $0xd8] sm:$0xff] }
  0x84   :  { %611 = vmatpush.msrb.mxu0 %v419_v12  ;;  %631 = vmatpush.msrb.mxu1 %v451_v13 }
  0x85   :  { %651 = vmatpush.msrb.mxu2 %v483_v36  ;;  %671 = vmatpush.msrb.mxu3 %v515_v49  ;;  %v1878_v36 = vld [vmem:[%s2385_s5 + $0xc8] sm:$0xff] }
  0x86   :  { %612 = vmatpush.msrb.mxu0 %v417_v14  ;;  %632 = vmatpush.msrb.mxu1 %v449_v15  ;;  %v1926_v49 = vld [vmem:[%s2385_s5 + $0xa8] sm:$0xff] }
  0x87   :  { %652 = vmatpush.msrb.mxu2 %v481_v40  ;;  %672 = vmatpush.msrb.mxu3 %v513_v51  ;;  %v1890_v40 = vld [vmem:[%s2385_s5 + $0xc0] sm:$0xff] }
  0x88   :  { %613 = vmatpush.msrb.mxu0 %v415_v16  ;;  %633 = vmatpush.msrb.mxu1 %v447_v17  ;;  %v1931_v51 = vld [vmem:[%s2385_s5 + $0x20] sm:$0xff] }
  0x89   :  { %653 = vmatpush.msrb.mxu2 %v479_v44  ;;  %673 = vmatpush.msrb.mxu3 %v511_v53  ;;  %v1907_v44 = vld [vmem:[%s2385_s5 + $0x30] sm:$0xff] }
  0x8a   :  { %614 = vmatpush.msrb.mxu0 %v413_v18  ;;  %634 = vmatpush.msrb.mxu1 %v445_v19 }
  0x8b   :  { %654 = vmatpush.msrb.mxu2 %v477_v48  ;;  %674 = vmatpush.msrb.mxu3 %v509_v55  ;;  %v1938_v55 = vld [vmem:[%s2385_s5 + $0x18] sm:$0xff] }
  0x8c   :  { %615 = vmatpush.msrb.mxu0 %v411_v22  ;;  %635 = vmatpush.msrb.mxu1 %v443_v23  ;;  %v1802_v23 = vld [vmem:[%s2385_s5 + $0x78] sm:$0xff] }
  0x8d   :  { %655 = vmatpush.msrb.mxu2 %v475_v50  ;;  %675 = vmatpush.msrb.mxu3 %v507_v57  ;;  %v1676_v57 = vmov 1.0  }
  0x8e   :  { %616 = vmatpush.msrb.mxu0 %v409_v26  ;;  %636 = vmatpush.msrb.mxu1 %v441_v27  ;;  %v1818_v26 = vld [vmem:[%s2385_s5 + $0x68] sm:$0xff]  ;;  %v1824_v27 = vld [vmem:[%s2385_s5 + $0xf0] sm:$0xff] }
  0x8f   :  { %656 = vmatpush.msrb.mxu2 %v473_v52  ;;  %676 = vmatpush.msrb.mxu3 %v505_v59 }
  0x90   :  { %617 = vmatpush.msrb.mxu0 %v407_v30  ;;  %637 = vmatpush.msrb.mxu1 %v439_v31  ;;  %v1842_v30 = vld [vmem:[%s2385_s5 + $0xe0] sm:$0xff]  ;;  %v1847_v31 = vld [vmem:[%s2385_s5 + $0x58] sm:$0xff] }
  0x91   :  { %657 = vmatpush.msrb.mxu2 %v471_v54  ;;  %677 = vmatpush.msrb.mxu3 %v503_v61 }
  0x92   :  { %618 = vmatpush.msrb.mxu0 %v405_v34  ;;  %638 = vmatpush.msrb.mxu1 %v437_v35  ;;  %v1866_v34 = vld [vmem:[%s2385_s5 + $0xd0] sm:$0xff]  ;;  %v1871_v35 = vld [vmem:[%s2385_s5 + $0x48] sm:$0xff] }
  0x93   :  { %658 = vmatpush.msrb.mxu2 %v469_v56  ;;  %678 = vmatpush.msrb.mxu3 %v501_v63 }
  0x94   :  { %619 = vmatpush.msrb.mxu0 %v403_v38  ;;  %639 = vmatpush.msrb.mxu1 %v435_v39  ;;  %v1883_v39 = vld [vmem:[%s2385_s5 + $0x40] sm:$0xff] }
  0x95   :  { %659 = vmatpush.msrb.mxu2 %v467_v58  ;;  %679 = vmatpush.msrb.mxu3 %v499_v0  ;;  %v1948_v58 = vld [vmem:[%s2385_s5 + $0x10] sm:$0xff]  ;;  %v1964_v0 = vld [vmem:[%s2385_s5] sm:$0xff] }
  0x96   :  { %620 = vmatpush.msrb.mxu0 %v401_v42  ;;  %640 = vmatpush.msrb.mxu1 %v433_v43  ;;  %v1895_v42 = vld [vmem:[%s2385_s5 + $0x38] sm:$0xff] }
  0x97   :  { %660 = vmatpush.msrb.mxu2 %v465_v60  ;;  %680 = vmatpush.msrb.mxu3 %v497_v6  ;;  %v1902_v43 = vld [vmem:[%s2385_s5 + $0xb8] sm:$0xff]  ;;  %v1954_v60 = vld [vmem:[%s2385_s5 + $0x8] sm:$0xff] }
  0x98   :  { %621 = vmatpush.msrb.mxu0 %v399_v46  ;;  %641 = vmatpush.msrb.mxu1 %v431_v47  ;;  %v1914_v46 = vld [vmem:[%s2385_s5 + $0xb0] sm:$0xff]  ;;  %v1919_v47 = vld [vmem:[%s2385_s5 + $0x28] sm:$0xff] }
  0x99   :  { %661 = vmatpush.msrb.mxu2 %v463_v62  ;;  %681 = vmatpush.msrb.mxu3 %v495_v9  ;;  %v813_v9 = vld [vmem:[%s2386_s6 + $0x18] sm:$0xff] }
  0xc5   :  { %v287_v1 = vpop.f32.mrf.mxu2  ;;  %v307_v2 = vpop.f32.mrf.mxu3 }
  0xc6   :  { %v247_v3 = vpop.f32.mrf.mxu0  ;;  %v267_v4 = vpop.f32.mrf.mxu1  ;;  %v308_v5 = vadd.f32 %v307_v2, %v287_v1  ;;  %v1969_v1 = vld [vmem:[%s2385_s5 + $0xa0] sm:$0xff]  ;;  %v1976_v2 = vld [vmem:[%s2385_s5 + $0x98] sm:$0xff] }
  0xc7   :  { %v268_v7 = vadd.f32 %v267_v4, %v247_v3  ;;  %v1981_v3 = vld [vmem:[%s2385_s5 + $0x90] sm:$0xff]  ;;  %v1987_v4 = vld [vmem:[%s2385_s5 + $0x88] sm:$0xff] }
  0xc8   :  { %v391_v8 = vmul.f32 0.2, %v308_v5 }
  0xc9   :  { %v390_v10 = vmul.f32 0.2, %v268_v7 }
  0xca   :  { %v395_v11 = vmax.f32 %v308_v5, %v391_v8  ;;  %v1994_v5 = vld [vmem:[%s2385_s5 + $0x80] sm:$0xff]  ;;  %v812_v8 = vld [vmem:[%s2386_s6 + $0x10] sm:$0xff] }
  0xcb   :  { %v394_v12 = vmax.f32 %v268_v7, %v390_v10  ;;  %v810_v10 = vld [vmem:[%s2386_s6] sm:$0xff] }
  0xcc   :  { %562 = vmatmul.f32.vlgmr.msra.gmra.mxu1 %v395_v11 }
  0xcd   :  { %542 = vmatmul.f32.vlgmr.msra.gmra.mxu0 %v394_v12 }
  0xce   :  { %832 = vmatpush.msra.mxu0 %v812_v8 }
  0xd0   :  { %833 = vmatpush.msra.mxu0 %v810_v10 }
  0xd4   :  { %642 = vmatmul.f32.vlgmr.msrb.gmra.mxu1 %v395_v11  ;;  %v811_v11 = vld [vmem:[%s2386_s6 + $0x8] sm:$0xff] }
  0xd5   :  { %v327_v13 = vpop.f32.mrf.mxu0  ;;  %v347_v14 = vpop.f32.mrf.mxu1  ;;  %622 = vmatmul.f32.vlgmr.msrb.gmra.mxu0 %v394_v12 }
  0xd6   :  { %v348_v15 = vadd.f32 %v347_v14, %v327_v13 }
  0xd8   :  { %v392_v16 = vmul.f32 0.2, %v348_v15 }
  0xda   :  { %v396_v17 = vmax.f32 %v348_v15, %v392_v16 }
  0xdc   :  { %v367_v18 = vpop.f32.mrf.mxu2  ;;  %v387_v19 = vpop.f32.mrf.mxu3  ;;  %582 = vmatmul.f32.vlgmr.msra.gmra.mxu2 %v396_v17 }
  0xdd   :  { %v388_v20 = vadd.f32 %v387_v19, %v367_v18  ;;  %769 = vmatpush.msra.mxu2 %v1802_v23 }
  0xdf   :  { %v393_v21 = vmul.f32 0.2, %v388_v20  ;;  %770 = vmatpush.msra.mxu2 %v1807_v24 }
  0xe1   :  { %v397_v22 = vmax.f32 %v388_v20, %v393_v21  ;;  %771 = vmatpush.msra.mxu2 %v1818_v26 }
  0xe3   :  { %602 = vmatmul.f32.vlgmr.msra.gmra.mxu3 %v397_v22  ;;  %772 = vmatpush.msra.mxu2 %v1835_v29 }
  0xe4   :  { %662 = vmatmul.f32.vlgmr.msrb.gmra.mxu2 %v396_v17  ;;  %789 = vmatpush.msra.mxu3 %v1813_v25 }
  0xe5   :  { %773 = vmatpush.msra.mxu2 %v1847_v31 }
  0xe6   :  { %790 = vmatpush.msra.mxu3 %v1824_v27 }
  0xe7   :  { %774 = vmatpush.msra.mxu2 %v1859_v33 }
  0xe8   :  { %791 = vmatpush.msra.mxu3 %v1830_v28 }
  0xe9   :  { %775 = vmatpush.msra.mxu2 %v1871_v35 }
  0xea   :  { %792 = vmatpush.msra.mxu3 %v1842_v30 }
  0xeb   :  { %682 = vmatmul.f32.vlgmr.msrb.gmra.mxu3 %v397_v22  ;;  %776 = vmatpush.msra.mxu2 %v1883_v39 }
  0xec   :  { %793 = vmatpush.msra.mxu3 %v1854_v32 }
  0xed   :  { %777 = vmatpush.msra.mxu2 %v1895_v42 }
  0xee   :  { %794 = vmatpush.msra.mxu3 %v1866_v34 }
  0xef   :  { %778 = vmatpush.msra.mxu2 %v1907_v44 }
  0xf0   :  { %795 = vmatpush.msra.mxu3 %v1878_v36 }
  0xf1   :  { %779 = vmatpush.msra.mxu2 %v1919_v47 }
  0xf2   :  { %796 = vmatpush.msra.mxu3 %v1890_v40 }
  0xf3   :  { %780 = vmatpush.msra.mxu2 %v1931_v51 }
  0xf4   :  { %797 = vmatpush.msra.mxu3 %v1902_v43 }
  0xf5   :  { %781 = vmatpush.msra.mxu2 %v1938_v55 }
  0xf6   :  { %798 = vmatpush.msra.mxu3 %v1914_v46 }
  0xf7   :  { %782 = vmatpush.msra.mxu2 %v1948_v58 }
  0xf8   :  { %799 = vmatpush.msra.mxu3 %v1926_v49 }
  0xf9   :  { %783 = vmatpush.msra.mxu2 %v1954_v60 }
  0xfa   :  { %800 = vmatpush.msra.mxu3 %v1969_v1 }
  0xfb   :  { %784 = vmatpush.msra.mxu2 %v1964_v0 }
  0xfc   :  { %801 = vmatpush.msra.mxu3 %v1976_v2 }
  0xfd   :  { %981 = vmatpush.msrb.mxu2 %v812_v8  ;;  %v1039_v8 = vld [vmem:[%s2387_s7 + $0x80] sm:$0xff] }
  0xfe   :  { %802 = vmatpush.msra.mxu3 %v1981_v3 }
  0xff   :  { %982 = vmatpush.msrb.mxu2 %v810_v10 }
 0x100   :  { %803 = vmatpush.msra.mxu3 %v1987_v4 }
 0x102   :  { %804 = vmatpush.msra.mxu3 %v1994_v5 }
 0x104   :  { %1001 = vmatpush.msrb.mxu3 %v813_v9 }
 0x106   :  { %1002 = vmatpush.msrb.mxu3 %v811_v11 }
 0x149   :  { %v563_v38 = vpop.f32.mrf.mxu1 }
 0x14a   :  { %v543_v37 = vpop.f32.mrf.mxu0 }
 0x14b   :  { %v564_v45 = vadd.f32 %v563_v38, %v543_v37  ;;  %v1050_v38 = vld [vmem:[%s2387_s7 + $0xd8] sm:$0xff] }
 0x151   :  { %v643_v54 = vpop.f32.mrf.mxu1 }
 0x152   :  { %v623_v53 = vpop.f32.mrf.mxu0 }
 0x153   :  { %v644_v59 = vadd.f32 %v643_v54, %v623_v53 }
 0x15f   :  { %v583_v41 = vpop.f32.mrf.mxu2 }
 0x160   :  { %v584_v48 = vadd.f32 %v583_v41, %v564_v45  ;;  %v1049_v41 = vld [vmem:[%s2387_s7 + $0xd0] sm:$0xff]  ;;  %v1031_v45 = vld [vmem:[%s2387_s7 + $0x40] sm:$0xff] }
 0x166   :  { %v603_v50 = vpop.f32.mrf.mxu3 }
 0x167   :  { %v604_v52 = vadd.f32 %v603_v50, %v584_v48  ;;  %v663_v56 = vpop.f32.mrf.mxu2  ;;  %v1046_v48 = vld [vmem:[%s2387_s7 + $0xb8] sm:$0xff]  ;;  %v1045_v50 = vld [vmem:[%s2387_s7 + $0xb0] sm:$0xff] }
 0x168   :  { %v664_v61 = vadd.f32 %v663_v56, %v644_v59  ;;  %v951_v56 = vld [vmem:[%s2408_s29] sm:$0x1]  ;;  %s1677_s29 = smov [#allocation7]  }
 0x169   :  { %1548 = vmatpush.msk.msra.mxu1 %vm690_vm0, %v604_v52  ;;  %s1535_s19 = sshll.u32 %s1677_s29, 4  ;;  %s1536_s19 = int_to_ptr.vmem [resolvable:$true] %s1535_s19 }
 0x16a   :  { %1549 = vmatmul.msk.f32.vlgmr.msra.gmra.mxu1 %vm686_vm1, %v1676_v57 }
 0x16e   :  { %v683_v62 = vpop.f32.mrf.mxu3 }
 0x16f   :  { %v684_v63 = vadd.f32 %v683_v62, %v664_v61  ;;  %v1028_v61 = vld [vmem:[%s2387_s7 + $0x28] sm:$0xff] }
 0x170   :  { %v1044_v62 = vld [vmem:[%s2387_s7 + $0xa8] sm:$0xff] }
 0x171   :  { %1550 = vmatpush.msk.msrb.mxu1 %vm690_vm0, %v684_v63 }
 0x172   :  { %1551 = vmatmul.msk.f32.vlgmr.msrb.gmra.mxu1 %vm686_vm1, %v1676_v57 }
 0x173   :  { %852 = vmatpush.msra.mxu1 %v813_v9  ;;  %v1011_v9 = vld [vmem:[%s2384_s4] sm:$0x3] }
 0x175   :  { %853 = vmatpush.msra.mxu1 %v811_v11 }
 0x1e7   :  { %v714_v6 = vpop.f32.mrf.mxu1 }
 0x1e8   :  { %785 = vmatmul.f32.vlgmr.msra.gmra.mxu2 %v714_v6  ;;  %v1040_v6 = vld [vmem:[%s2387_s7 + $0x88] sm:$0xff] }
 0x1ef   :  { %v734_v7 = vpop.f32.mrf.mxu1 }
 0x1f0   :  { %805 = vmatmul.f32.vlgmr.msra.gmra.mxu3 %v734_v7  ;;  %v1023_v7 = vld [vmem:[%s2387_s7] sm:$0xff] }
 0x26b   :  { %v786_v12 = vpop.f32.mrf.mxu2 }
 0x273   :  { %v806_v13 = vpop.f32.mrf.mxu3 }
 0x274   :  { %v807_v14 = vadd.f32 %v806_v13, %v786_v12  ;;  %v1013_v13 = vperm.slane %v1011_v9, 0 }
 0x276   :  { %v809_v15 = vmul.f32 0.03125, %v807_v14 }
 0x278   :  { %1552 = vmatmul.msk.f32.vlgmr.msra.gmra.mxu0 %vm814_vm2, %v809_v15  ;;  %1553 = vmatmul.msk.f32.vlgmr.msra.gmra.mxu1 %vm814_vm2, %v809_v15  ;;  %v1014_v15 = vperm.slane %v1011_v9, 1 }
 0x2f5   :  { %v835_v16 = vpop.f32.mrf.mxu0  ;;  %v855_v17 = vpop.f32.mrf.mxu1 }
 0x2f6   :  { %v858_v18 = vperm.slane %v835_v16, 0  ;;  %v859_v19 = vperm.slane %v855_v17, 0 }
 0x2f8   :  { %v2011_v20 = vsub.f32 %v604_v52, %v858_v18  ;;  %v2013_v21 = vsub.f32 %v684_v63, %v859_v19  ;;  %v1027_v63 = vld [vmem:[%s2387_s7 + $0x20] sm:$0xff] }
 0x2fa   :  { %v862_v22 = vmul.f32 %v2011_v20, %v2011_v20  ;;  %v863_v37 = vmul.f32 %v2013_v21, %v2013_v21 }
 0x2fc   :  { %1554 = vmatpush.msk.msrb.mxu0 %vm690_vm0, %v862_v22  ;;  %1556 = vmatpush.msk.msrb.mxu1 %vm690_vm0, %v863_v37 }
 0x2fd   :  { %1555 = vmatmul.msk.f32.vlgmr.msrb.gmra.mxu0 %vm686_vm1, %v1676_v57  ;;  %1557 = vmatmul.msk.f32.vlgmr.msrb.gmra.mxu1 %vm686_vm1, %v1676_v57 }
 0x2fe   :  { %910 = vmatpush.msra.mxu0 %v1802_v23  ;;  %930 = vmatpush.msra.mxu1 %v1813_v25  ;;  %v1038_v25 = vld [vmem:[%s2387_s7 + $0x78] sm:$0xff] }
 0x2ff   :  { %1055 = vmatpush.msra.mxu2 %v1038_v25  ;;  %v1133_v25 = vld [vmem:[%s2390_s10 + $0x78] sm:$0xff] }
 0x300   :  { %911 = vmatpush.msra.mxu0 %v1807_v24  ;;  %931 = vmatpush.msra.mxu1 %v1824_v27  ;;  %v1037_v27 = vld [vmem:[%s2387_s7 + $0x70] sm:$0xff] }
 0x301   :  { %1056 = vmatpush.msra.mxu2 %v1037_v27  ;;  %v1129_v27 = vld [vmem:[%s2390_s10 + $0x58] sm:$0xff] }
 0x302   :  { %912 = vmatpush.msra.mxu0 %v1818_v26  ;;  %932 = vmatpush.msra.mxu1 %v1830_v28  ;;  %v1054_v26 = vld [vmem:[%s2387_s7 + $0xf8] sm:$0xff]  ;;  %v1053_v28 = vld [vmem:[%s2387_s7 + $0xf0] sm:$0xff] }
 0x303   :  { %1075 = vmatpush.msra.mxu3 %v1054_v26  ;;  %v1132_v26 = vld [vmem:[%s2390_s10 + $0x70] sm:$0xff] }
 0x304   :  { %913 = vmatpush.msra.mxu0 %v1835_v29  ;;  %933 = vmatpush.msra.mxu1 %v1842_v30  ;;  %v1036_v29 = vld [vmem:[%s2387_s7 + $0x68] sm:$0xff] }
 0x305   :  { %v1052_v30 = vld [vmem:[%s2387_s7 + $0xe8] sm:$0xff]  ;;  %1076 = vmatpush.msra.mxu3 %v1053_v28  ;;  %1057 = vmatpush.msra.mxu2 %v1036_v29  ;;  %v1128_v28 = vld [vmem:[%s2390_s10 + $0x50] sm:$0xff] }
 0x306   :  { %914 = vmatpush.msra.mxu0 %v1847_v31  ;;  %934 = vmatpush.msra.mxu1 %v1854_v32  ;;  %v1035_v31 = vld [vmem:[%s2387_s7 + $0x60] sm:$0xff]  ;;  %v1127_v29 = vld [vmem:[%s2390_s10 + $0x48] sm:$0xff] }
 0x307   :  { %v1051_v32 = vld [vmem:[%s2387_s7 + $0xe0] sm:$0xff]  ;;  %1077 = vmatpush.msra.mxu3 %v1052_v30  ;;  %1058 = vmatpush.msra.mxu2 %v1035_v31  ;;  %v1125_v31 = vld [vmem:[%s2390_s10 + $0x38] sm:$0xff] }
 0x308   :  { %915 = vmatpush.msra.mxu0 %v1859_v33  ;;  %935 = vmatpush.msra.mxu1 %v1866_v34  ;;  %v1126_v30 = vld [vmem:[%s2390_s10 + $0x40] sm:$0xff] }
 0x309   :  { %1078 = vmatpush.msra.mxu3 %v1051_v32  ;;  %v1124_v32 = vld [vmem:[%s2390_s10 + $0x30] sm:$0xff] }
 0x30a   :  { %916 = vmatpush.msra.mxu0 %v1871_v35  ;;  %936 = vmatpush.msra.mxu1 %v1878_v36  ;;  %v1034_v36 = vld [vmem:[%s2387_s7 + $0x58] sm:$0xff] }
 0x30b   :  { %1059 = vmatpush.msra.mxu2 %v1034_v36  ;;  %1079 = vmatpush.msra.mxu3 %v1050_v38  ;;  %v1120_v36 = vld [vmem:[%s2390_s10 + $0x10] sm:$0xff]  ;;  %v1119_v38 = vld [vmem:[%s2390_s10 + $0x8] sm:$0xff] }
 0x30c   :  { %917 = vmatpush.msra.mxu0 %v1883_v39  ;;  %937 = vmatpush.msra.mxu1 %v1890_v40  ;;  %v1033_v40 = vld [vmem:[%s2387_s7 + $0x50] sm:$0xff] }
 0x30d   :  { %1060 = vmatpush.msra.mxu2 %v1033_v40  ;;  %1080 = vmatpush.msra.mxu3 %v1049_v41 }
 0x30e   :  { %918 = vmatpush.msra.mxu0 %v1895_v42  ;;  %938 = vmatpush.msra.mxu1 %v1902_v43  ;;  %v1032_v43 = vld [vmem:[%s2387_s7 + $0x48] sm:$0xff] }
 0x30f   :  { %1061 = vmatpush.msra.mxu2 %v1032_v43  ;;  %v1158_v43 = vld [vmem:[%s2391_s11 + $0x18] sm:$0xff] }
 0x310   :  { %919 = vmatpush.msra.mxu0 %v1907_v44  ;;  %939 = vmatpush.msra.mxu1 %v1914_v46  ;;  %v1048_v44 = vld [vmem:[%s2387_s7 + $0xc8] sm:$0xff]  ;;  %v1047_v46 = vld [vmem:[%s2387_s7 + $0xc0] sm:$0xff] }
 0x311   :  { %1081 = vmatpush.msra.mxu3 %v1048_v44  ;;  %1062 = vmatpush.msra.mxu2 %v1031_v45  ;;  %v1157_v44 = vld [vmem:[%s2391_s11 + $0x10] sm:$0xff] }
 0x312   :  { %920 = vmatpush.msra.mxu0 %v1919_v47  ;;  %940 = vmatpush.msra.mxu1 %v1926_v49  ;;  %v1030_v47 = vld [vmem:[%s2387_s7 + $0x38] sm:$0xff]  ;;  %v1029_v49 = vld [vmem:[%s2387_s7 + $0x30] sm:$0xff] }
 0x313   :  { %1082 = vmatpush.msra.mxu3 %v1047_v46  ;;  %1063 = vmatpush.msra.mxu2 %v1030_v47  ;;  %v1156_v46 = vld [vmem:[%s2391_s11 + $0x8] sm:$0xff]  ;;  %v1155_v47 = vld [vmem:[%s2391_s11] sm:$0xff] }
 0x314   :  { %921 = vmatpush.msra.mxu0 %v1931_v51  ;;  %941 = vmatpush.msra.mxu1 %v1969_v1  ;;  %v1026_v1 = vld [vmem:[%s2387_s7 + $0x18] sm:$0xff] }
 0x315   :  { %1083 = vmatpush.msra.mxu3 %v1046_v48  ;;  %1064 = vmatpush.msra.mxu2 %v1029_v49 }
 0x316   :  { %922 = vmatpush.msra.mxu0 %v1938_v55  ;;  %942 = vmatpush.msra.mxu1 %v1976_v2  ;;  %v1042_v2 = vld [vmem:[%s2387_s7 + $0x98] sm:$0xff] }
 0x317   :  { %1084 = vmatpush.msra.mxu3 %v1045_v50  ;;  %1065 = vmatpush.msra.mxu2 %v1028_v61 }
 0x318   :  { %923 = vmatpush.msra.mxu0 %v1948_v58  ;;  %943 = vmatpush.msra.mxu1 %v1981_v3  ;;  %v1025_v3 = vld [vmem:[%s2387_s7 + $0x10] sm:$0xff] }
 0x319   :  { %1085 = vmatpush.msra.mxu3 %v1044_v62  ;;  %1066 = vmatpush.msra.mxu2 %v1027_v63  ;;  %v1285_v63 = vld [vmem:[%s2392_s12 + $0x50] sm:$0xff] }
 0x31a   :  { %924 = vmatpush.msra.mxu0 %v1954_v60  ;;  %944 = vmatpush.msra.mxu1 %v1987_v4  ;;  %v1041_v4 = vld [vmem:[%s2387_s7 + $0x90] sm:$0xff] }
 0x31b   :  { %1067 = vmatpush.msra.mxu2 %v1026_v1  ;;  %v1284_v1 = vld [vmem:[%s2392_s12 + $0x48] sm:$0xff] }
 0x31c   :  { %925 = vmatpush.msra.mxu0 %v1964_v0  ;;  %945 = vmatpush.msra.mxu1 %v1994_v5  ;;  %v1043_v0 = vld [vmem:[%s2387_s7 + $0xa0] sm:$0xff]  ;;  %v1024_v5 = vld [vmem:[%s2387_s7 + $0x8] sm:$0xff] }
 0x31d   :  { %1086 = vmatpush.msra.mxu3 %v1043_v0  ;;  %1068 = vmatpush.msra.mxu2 %v1025_v3  ;;  %v1282_v3 = vld [vmem:[%s2392_s12 + $0x38] sm:$0xff] }
 0x31e   :  { %1134 = vmatpush.msrb.mxu1 %v1133_v25 }
 0x31f   :  { %1087 = vmatpush.msra.mxu3 %v1042_v2  ;;  %1069 = vmatpush.msra.mxu2 %v1024_v5  ;;  %v1283_v2 = vld [vmem:[%s2392_s12 + $0x40] sm:$0xff] }
 0x320   :  { %1135 = vmatpush.msrb.mxu1 %v1132_v26 }
 0x321   :  { %1088 = vmatpush.msra.mxu3 %v1041_v4  ;;  %1070 = vmatpush.msra.mxu2 %v1023_v7  ;;  %v1281_v4 = vld [vmem:[%s2392_s12 + $0x30] sm:$0xff] }
 0x323   :  { %1089 = vmatpush.msra.mxu3 %v1040_v6 }
 0x325   :  { %1090 = vmatpush.msra.mxu3 %v1039_v8 }
 0x37a   :  { %v887_v23 = vpop.f32.mrf.mxu0  ;;  %v907_v24 = vpop.f32.mrf.mxu1 }
 0x37b   :  { %926 = vmatmul.f32.vlgmr.msra.gmra.mxu0 %v887_v23  ;;  %946 = vmatmul.f32.vlgmr.msra.gmra.mxu1 %v907_v24 }
 0x3f8   :  { %v927_v33 = vpop.f32.mrf.mxu0  ;;  %v947_v34 = vpop.f32.mrf.mxu1 }
 0x3f9   :  { %v948_v35 = vadd.f32 %v947_v34, %v927_v33  ;;  %v1123_v33 = vld [vmem:[%s2390_s10 + $0x28] sm:$0xff]  ;;  %v1122_v34 = vld [vmem:[%s2390_s10 + $0x20] sm:$0xff] }
 0x3fb   :  { %v950_v39 = vmul.f32 0.03125, %v948_v35  ;;  %v1121_v35 = vld [vmem:[%s2390_s10 + $0x18] sm:$0xff] }
 0x3fd   :  { %v952_v42 = vadd.f32 1e-05, %v950_v39 }
 0x3ff   :  { %1586 = vrsqrt.f32 %v952_v42  ;;  %vm959_vm4 = vweird.f32 %v952_v42 }
 0x405   :  { %v1587_v51 = vpop.eup %1586 }
 0x406   :  { %v954_v52 = vmul.f32 %v1587_v51, %v952_v42  ;;  %vm960_vm3 = vweird.f32 %v1587_v51  ;;  %v1118_v42 = vld [vmem:[%s2390_s10] sm:$0xff] }
 0x407   :  { %vm961_vm5 = vmor %vm959_vm4, %vm960_vm3 }
 0x408   :  { %v955_v53 = vmul.f32 %v1587_v51, %v954_v52 }
 0x40a   :  { %v956_v54 = vmul.f32 0.5, %v955_v53 }
 0x40c   :  { %v957_v55 = vsub.f32 1.5, %v956_v54 }
 0x40e   :  { %v958_v58 = vmul.f32 %v1587_v51, %v957_v55  ;;  %v1290_v55 = vld [vmem:[%s2392_s12 + $0x78] sm:$0xff] }
 0x410   :  { %v962_v59 = vsel %vm961_vm5, %v1587_v51, %v958_v58  ;;  %v1288_v58 = vld [vmem:[%s2392_s12 + $0x68] sm:$0xff] }
 0x411   :  { %v963_v60 = vmul.f32 %v962_v59, %v951_v56  ;;  %v1289_v56 = vld [vmem:[%s2392_s12 + $0x70] sm:$0xff]  ;;  %v1287_v59 = vld [vmem:[%s2392_s12 + $0x60] sm:$0xff] }
 0x413   :  { %1558 = vmatmul.msk.f32.vlgmr.msrb.gmra.mxu2 %vm814_vm2, %v963_v60  ;;  %1559 = vmatmul.msk.f32.vlgmr.msrb.gmra.mxu3 %vm814_vm2, %v963_v60  ;;  %v1286_v60 = vld [vmem:[%s2392_s12 + $0x58] sm:$0xff] }
 0x414   :  { %1209 = vmatpush.msrb.mxu2 %v1133_v25  ;;  %1258 = vmatpush.msrb.mxu3 %v1158_v43 }
 0x416   :  { %1210 = vmatpush.msrb.mxu2 %v1132_v26  ;;  %1259 = vmatpush.msrb.mxu3 %v1157_v44 }
 0x418   :  { %1260 = vmatpush.msrb.mxu3 %v1156_v46 }
 0x41a   :  { %1261 = vmatpush.msrb.mxu3 %v1155_v47 }
 0x496   :  { %v984_v10 = vpop.f32.mrf.mxu2  ;;  %v1004_v11 = vpop.f32.mrf.mxu3 }
 0x497   :  { %v1007_v12 = vperm.slane %v984_v10, 0  ;;  %v1008_v14 = vperm.slane %v1004_v11, 0  ;;  %v1230_v10 = vld [vmem:[%s2388_s8] sm:$0x1] }
 0x499   :  { %v1009_v16 = vmul.f32 %v1007_v12, %v2011_v20  ;;  %v1010_v17 = vmul.f32 %v1008_v14, %v2013_v21  ;;  %v1131_v20 = vld [vmem:[%s2390_s10 + $0x68] sm:$0xff]  ;;  %v1130_v21 = vld [vmem:[%s2390_s10 + $0x60] sm:$0xff] }
 0x49a   :  { %1136 = vmatpush.msrb.mxu1 %v1131_v20  ;;  %1211 = vmatpush.msrb.mxu2 %v1131_v20  ;;  %v1280_v14 = vld [vmem:[%s2392_s12 + $0x28] sm:$0xff] }
 0x49b   :  { %v1017_v18 = vadd.f32 %v1013_v13, %v1009_v16  ;;  %v1018_v19 = vadd.f32 %v1014_v15, %v1010_v17  ;;  %v1279_v15 = vld [vmem:[%s2392_s12 + $0x20] sm:$0xff]  ;;  %v1278_v16 = vld [vmem:[%s2392_s12 + $0x18] sm:$0xff]  ;;  %v1277_v17 = vld [vmem:[%s2392_s12 + $0x10] sm:$0xff] }
 0x49c   :  { %1137 = vmatpush.msrb.mxu1 %v1130_v21  ;;  %1212 = vmatpush.msrb.mxu2 %v1130_v21  ;;  %v1341_v21 = vld [vmem:[%s2395_s15 + $0x38] sm:$0xff] }
 0x49d   :  { %v1019_v22 = vmul.f32 0.2, %v1017_v18  ;;  %v1020_v37 = vmul.f32 0.2, %v1018_v19 }
 0x49e   :  { %1138 = vmatpush.msrb.mxu1 %v1129_v27  ;;  %1213 = vmatpush.msrb.mxu2 %v1129_v27  ;;  %v1340_v27 = vld [vmem:[%s2395_s15 + $0x30] sm:$0xff] }
 0x49f   :  { %v1021_v23 = vmax.f32 %v1017_v18, %v1019_v22  ;;  %v1022_v24 = vmax.f32 %v1018_v19, %v1020_v37  ;;  %v1276_v18 = vld [vmem:[%s2392_s12 + $0x8] sm:$0xff]  ;;  %v1275_v19 = vld [vmem:[%s2392_s12] sm:$0xff]  ;;  %s1537_s12 = sshll.u32 %s2409_s30, 4  ;;  %s1538_s12 = int_to_ptr.hbm [resolvable:$true] %s1537_s12 }
 0x4a0   :  { %1139 = vmatpush.msrb.mxu1 %v1128_v28  ;;  %1214 = vmatpush.msrb.mxu2 %v1128_v28  ;;  %v1339_v28 = vld [vmem:[%s2395_s15 + $0x28] sm:$0xff] }
 0x4a1   :  { %1071 = vmatmul.f32.vlgmr.msra.gmra.mxu2 %v1021_v23  ;;  %1091 = vmatmul.f32.vlgmr.msra.gmra.mxu3 %v1022_v24  ;;  %v1583_v23 = vld [vmem:[%s2389_s9] ss:$0 sm:$0xff] }
 0x4a2   :  { %1140 = vmatpush.msrb.mxu1 %v1127_v29  ;;  %1215 = vmatpush.msrb.mxu2 %v1127_v29  ;;  %v1338_v29 = vld [vmem:[%s2395_s15 + $0x20] sm:$0xff] }
 0x4a4   :  { %1141 = vmatpush.msrb.mxu1 %v1126_v30  ;;  %1216 = vmatpush.msrb.mxu2 %v1126_v30  ;;  %v1337_v30 = vld [vmem:[%s2395_s15 + $0x18] sm:$0xff] }
 0x4a6   :  { %1142 = vmatpush.msrb.mxu1 %v1125_v31  ;;  %1217 = vmatpush.msrb.mxu2 %v1125_v31  ;;  %v1336_v31 = vld [vmem:[%s2395_s15 + $0x10] sm:$0xff] }
 0x4a8   :  { %1143 = vmatpush.msrb.mxu1 %v1124_v32  ;;  %1218 = vmatpush.msrb.mxu2 %v1124_v32  ;;  %v1335_v32 = vld [vmem:[%s2395_s15 + $0x8] sm:$0xff] }
 0x4aa   :  { %1144 = vmatpush.msrb.mxu1 %v1123_v33  ;;  %1219 = vmatpush.msrb.mxu2 %v1123_v33 }
 0x4ac   :  { %1145 = vmatpush.msrb.mxu1 %v1122_v34  ;;  %1220 = vmatpush.msrb.mxu2 %v1122_v34  ;;  %v1334_v34 = vld [vmem:[%s2395_s15] sm:$0xff] }
 0x4ae   :  { %1146 = vmatpush.msrb.mxu1 %v1121_v35  ;;  %1221 = vmatpush.msrb.mxu2 %v1121_v35  ;;  %v1374_v35 = vld [vmem:[%s2396_s16 + $0x38] sm:$0xff] }
 0x4b0   :  { %1147 = vmatpush.msrb.mxu1 %v1120_v36  ;;  %1222 = vmatpush.msrb.mxu2 %v1120_v36  ;;  %v1373_v36 = vld [vmem:[%s2396_s16 + $0x30] sm:$0xff] }
 0x4b2   :  { %1148 = vmatpush.msrb.mxu1 %v1119_v38  ;;  %1223 = vmatpush.msrb.mxu2 %v1119_v38  ;;  %v1372_v38 = vld [vmem:[%s2396_s16 + $0x28] sm:$0xff] }
 0x4b4   :  { %1149 = vmatpush.msrb.mxu1 %v1118_v42  ;;  %1224 = vmatpush.msrb.mxu2 %v1118_v42 }
 0x4b6   :  { %1354 = vmatpush.msra.mxu1 %v1341_v21  ;;  %1435 = vmatpush.msra.mxu2 %v1341_v21 }
 0x4b8   :  { %1355 = vmatpush.msra.mxu1 %v1340_v27  ;;  %1436 = vmatpush.msra.mxu2 %v1340_v27 }
 0x4ba   :  { %1356 = vmatpush.msra.mxu1 %v1339_v28  ;;  %1437 = vmatpush.msra.mxu2 %v1339_v28 }
 0x4bc   :  { %1357 = vmatpush.msra.mxu1 %v1338_v29  ;;  %1438 = vmatpush.msra.mxu2 %v1338_v29 }
 0x4be   :  { %1358 = vmatpush.msra.mxu1 %v1337_v30  ;;  %1439 = vmatpush.msra.mxu2 %v1337_v30 }
 0x4c0   :  { %1359 = vmatpush.msra.mxu1 %v1336_v31  ;;  %1440 = vmatpush.msra.mxu2 %v1336_v31 }
 0x4c2   :  { %1360 = vmatpush.msra.mxu1 %v1335_v32  ;;  %1441 = vmatpush.msra.mxu2 %v1335_v32 }
 0x4c4   :  { %1361 = vmatpush.msra.mxu1 %v1334_v34  ;;  %1442 = vmatpush.msra.mxu2 %v1334_v34 }
 0x524   :  { %v1072_v39 = vpop.f32.mrf.mxu2  ;;  %v1092_v40 = vpop.f32.mrf.mxu3 }
 0x525   :  { %v1093_v41 = vadd.f32 %v1092_v40, %v1072_v39  ;;  %v1371_v39 = vld [vmem:[%s2396_s16 + $0x20] sm:$0xff]  ;;  %v1370_v40 = vld [vmem:[%s2396_s16 + $0x18] sm:$0xff] }
 0x527   :  { %1560 = vmatpush.msk.msrb.mxu0 %vm690_vm0, %v1093_v41 }
 0x528   :  { %1561 = vmatmul.msk.f32.vlgmr.msrb.gmra.mxu0 %vm686_vm1, %v1676_v57 }
 0x529   :  { %1175 = vmatpush.msra.mxu0 %v1158_v43  ;;  %v1368_v43 = vld [vmem:[%s2396_s16 + $0x8] sm:$0xff] }
 0x52b   :  { %1176 = vmatpush.msra.mxu0 %v1157_v44  ;;  %v1367_v44 = vld [vmem:[%s2396_s16] sm:$0xff] }
 0x52d   :  { %1177 = vmatpush.msra.mxu0 %v1156_v46 }
 0x52f   :  { %1178 = vmatpush.msra.mxu0 %v1155_v47 }
 0x5a5   :  { %v1115_v45 = vpop.f32.mrf.mxu0 }
 0x5a6   :  { %1150 = vmatmul.f32.vlgmr.msrb.gmra.mxu1 %v1115_v45 }
 0x623   :  { %v1151_v48 = vpop.f32.mrf.mxu1 }
 0x624   :  { %v1154_v49 = vmul.f32 0.125, %v1151_v48 }
 0x626   :  { %1562 = vmatmul.msk.f32.vlgmr.msra.gmra.mxu0 %vm1159_vm6, %v1154_v49 }
 0x6a3   :  { %v1180_v50 = vpop.f32.mrf.mxu0 }
 0x6a4   :  { %v1183_v51 = vperm.slane %v1180_v50, 0 }
 0x6a6   :  { %v1184_v52 = vsub.f32 %v1093_v41, %v1183_v51  ;;  %v1369_v41 = vld [vmem:[%s2396_s16 + $0x10] sm:$0xff] }
 0x6a8   :  { %v1185_v53 = vmul.f32 %v1184_v52, %v1184_v52 }
 0x6aa   :  { %1563 = vmatpush.msk.msrb.mxu0 %vm690_vm0, %v1185_v53  ;;  %v1499_v53 = vld [vmem:[%s2397_s17 + $0x30] sm:$0xff] }
 0x6ab   :  { %1564 = vmatmul.msk.f32.vlgmr.msrb.gmra.mxu0 %vm686_vm1, %v1676_v57 }
 0x6ac   :  { %1291 = vmatpush.msra.mxu0 %v1290_v55 }
 0x6ae   :  { %1292 = vmatpush.msra.mxu0 %v1289_v56 }
 0x6b0   :  { %1293 = vmatpush.msra.mxu0 %v1288_v58 }
 0x6b2   :  { %1294 = vmatpush.msra.mxu0 %v1287_v59 }
 0x6b4   :  { %1295 = vmatpush.msra.mxu0 %v1286_v60 }
 0x6b6   :  { %1296 = vmatpush.msra.mxu0 %v1285_v63 }
 0x6b8   :  { %1297 = vmatpush.msra.mxu0 %v1284_v1 }
 0x6ba   :  { %1298 = vmatpush.msra.mxu0 %v1283_v2  ;;  %v1498_v2 = vld [vmem:[%s2397_s17 + $0x28] sm:$0xff] }
 0x6bc   :  { %1299 = vmatpush.msra.mxu0 %v1282_v3  ;;  %v1497_v3 = vld [vmem:[%s2397_s17 + $0x20] sm:$0xff] }
 0x6be   :  { %1300 = vmatpush.msra.mxu0 %v1281_v4  ;;  %v1496_v4 = vld [vmem:[%s2397_s17 + $0x18] sm:$0xff] }
 0x6c0   :  { %1301 = vmatpush.msra.mxu0 %v1280_v14 }
 0x6c2   :  { %1302 = vmatpush.msra.mxu0 %v1279_v15  ;;  %v1585_v15 = vld [vmem:[%s2398_s18] ss:$0 sm:$0xff] }
 0x6c4   :  { %1303 = vmatpush.msra.mxu0 %v1278_v16 }
 0x6c6   :  { %1304 = vmatpush.msra.mxu0 %v1277_v17 }
 0x6c8   :  { %1305 = vmatpush.msra.mxu0 %v1276_v18 }
 0x6ca   :  { %1306 = vmatpush.msra.mxu0 %v1275_v19 }
 0x728   :  { %v1206_v54 = vpop.f32.mrf.mxu0 }
 0x729   :  { %1225 = vmatmul.f32.vlgmr.msrb.gmra.mxu2 %v1206_v54 }
 0x7ac   :  { %v1226_v61 = vpop.f32.mrf.mxu2 }
 0x7ad   :  { %v1229_v62 = vmul.f32 0.125, %v1226_v61 }
 0x7af   :  { %v1231_v0 = vadd.f32 1e-05, %v1229_v62  ;;  %v1448_v62 = vld [vmem:[%s2393_s13] sm:$0x1] }
 0x7b1   :  { %1588 = vrsqrt.f32 %v1231_v0  ;;  %vm1238_vm8 = vweird.f32 %v1231_v0 }
 0x7b7   :  { %v1589_v5 = vpop.eup %1588 }
 0x7b8   :  { %v1233_v6 = vmul.f32 %v1589_v5, %v1231_v0  ;;  %vm1239_vm7 = vweird.f32 %v1589_v5 }
 0x7b9   :  { %vm1240_vm9 = vmor %vm1238_vm8, %vm1239_vm7 }
 0x7ba   :  { %v1234_v7 = vmul.f32 %v1589_v5, %v1233_v6  ;;  %v1494_v6 = vld [vmem:[%s2397_s17 + $0x8] sm:$0xff] }
 0x7bc   :  { %v1235_v8 = vmul.f32 0.5, %v1234_v7  ;;  %v1493_v7 = vld [vmem:[%s2397_s17] sm:$0xff] }
 0x7be   :  { %v1236_v9 = vsub.f32 1.5, %v1235_v8 }
 0x7c0   :  { %v1237_v11 = vmul.f32 %v1589_v5, %v1236_v9 }
 0x7c2   :  { %v1241_v12 = vsel %vm1240_vm9, %v1589_v5, %v1237_v11  ;;  %v1495_v5 = vld [vmem:[%s2397_s17 + $0x10] sm:$0xff] }
 0x7c3   :  { %v1242_v13 = vmul.f32 %v1241_v12, %v1230_v10  ;;  %v1584_v10 = vld [vmem:[%s2394_s14] ss:$0 sm:$0xff] }
 0x7c5   :  { %1565 = vmatmul.msk.f32.vlgmr.msrb.gmra.mxu3 %vm1159_vm6, %v1242_v13 }
 0x848   :  { %v1263_v22 = vpop.f32.mrf.mxu3 }
 0x849   :  { %v1266_v37 = vperm.slane %v1263_v22, 0 }
 0x84b   :  { %v1267_v24 = vmul.f32 %v1266_v37, %v1184_v52  ;;  %v1500_v52 = vld [vmem:[%s2397_s17 + $0x38] sm:$0xff] }
 0x84c   :  { %1516 = vmatpush.msrb.mxu0 %v1500_v52 }
 0x84d   :  { %v1272_v25 = vadd.f32 %v1583_v23, %v1267_v24 }
 0x84e   :  { %1517 = vmatpush.msrb.mxu0 %v1499_v53 }
 0x84f   :  { %v1273_v26 = vmul.f32 0.2, %v1272_v25 }
 0x850   :  { %1518 = vmatpush.msrb.mxu0 %v1498_v2 }
 0x851   :  { %v1274_v20 = vmax.f32 %v1272_v25, %v1273_v26 }
 0x852   :  { %1519 = vmatpush.msrb.mxu0 %v1497_v3 }
 0x853   :  { %1307 = vmatmul.f32.vlgmr.msra.gmra.mxu0 %v1274_v20 }
 0x854   :  { %1520 = vmatpush.msrb.mxu0 %v1496_v4 }
 0x856   :  { %1521 = vmatpush.msrb.mxu0 %v1495_v5 }
 0x858   :  { %1522 = vmatpush.msrb.mxu0 %v1494_v6 }
 0x85a   :  { %1523 = vmatpush.msrb.mxu0 %v1493_v7 }
 0x8d0   :  { %v1308_v33 = vpop.f32.mrf.mxu0 }
 0x8d1   :  { %1566 = vmatpush.msk.msra.mxu3 %vm690_vm0, %v1308_v33 }
 0x8d2   :  { %1567 = vmatmul.msk.f32.vlgmr.msra.gmra.mxu3 %vm686_vm1, %v1676_v57 }
 0x8d3   :  { %1386 = vmatpush.msrb.mxu3 %v1374_v35 }
 0x8d5   :  { %1387 = vmatpush.msrb.mxu3 %v1373_v36 }
 0x8d7   :  { %1388 = vmatpush.msrb.mxu3 %v1372_v38 }
 0x8d9   :  { %1389 = vmatpush.msrb.mxu3 %v1371_v39 }
 0x8db   :  { %1390 = vmatpush.msrb.mxu3 %v1370_v40 }
 0x8dd   :  { %1391 = vmatpush.msrb.mxu3 %v1369_v41 }
 0x8df   :  { %1392 = vmatpush.msrb.mxu3 %v1368_v43 }
 0x8e1   :  { %1393 = vmatpush.msrb.mxu3 %v1367_v44 }
 0x8e3   :  { %1472 = vmatpush.msra.mxu3 %v1374_v35 }
 0x8e5   :  { %1473 = vmatpush.msra.mxu3 %v1373_v36 }
 0x8e7   :  { %1474 = vmatpush.msra.mxu3 %v1372_v38 }
 0x8e9   :  { %1475 = vmatpush.msra.mxu3 %v1371_v39 }
 0x8eb   :  { %1476 = vmatpush.msra.mxu3 %v1370_v40 }
 0x8ed   :  { %1477 = vmatpush.msra.mxu3 %v1369_v41 }
 0x8ef   :  { %1478 = vmatpush.msra.mxu3 %v1368_v43 }
 0x8f1   :  { %1479 = vmatpush.msra.mxu3 %v1367_v44 }
 0x955   :  { %v1331_v42 = vpop.f32.mrf.mxu3 }
 0x956   :  { %1568 = vmatmul.msk.f32.vlgmr.msra.gmra.mxu1 %vm1342_vm10, %v1331_v42 }
 0x9d3   :  { %v1363_v45 = vpop.f32.mrf.mxu1 }
 0x9d4   :  { %v1366_v46 = vmul.f32 0.5, %v1363_v45 }
 0x9d6   :  { %1569 = vmatmul.msk.f32.vlgmr.msrb.gmra.mxu3 %vm1342_vm10, %v1366_v46 }
 0xa59   :  { %v1395_v47 = vpop.f32.mrf.mxu3 }
 0xa5a   :  { %v1398_v48 = vperm.slane %v1395_v47, 0 }
 0xa5c   :  { %v1399_v49 = vsub.f32 %v1308_v33, %v1398_v48 }
 0xa5e   :  { %v1400_v50 = vmul.f32 %v1399_v49, %v1399_v49 }
 0xa60   :  { %1570 = vmatpush.msk.msrb.mxu1 %vm690_vm0, %v1400_v50 }
 0xa61   :  { %1571 = vmatmul.msk.f32.vlgmr.msrb.gmra.mxu1 %vm686_vm1, %v1676_v57 }
 0xade   :  { %v1421_v51 = vpop.f32.mrf.mxu1 }
 0xadf   :  { %1572 = vmatmul.msk.f32.vlgmr.msra.gmra.mxu2 %vm1342_vm10, %v1421_v51 }
 0xb62   :  { %v1444_v54 = vpop.f32.mrf.mxu2 }
 0xb63   :  { %v1447_v55 = vmul.f32 0.5, %v1444_v54 }
 0xb65   :  { %v1449_v56 = vadd.f32 1e-05, %v1447_v55 }
 0xb67   :  { %1590 = vrsqrt.f32 %v1449_v56  ;;  %vm1456_vm12 = vweird.f32 %v1449_v56 }
 0xb6d   :  { %v1591_v58 = vpop.eup %1590 }
 0xb6e   :  { %v1451_v59 = vmul.f32 %v1591_v58, %v1449_v56  ;;  %vm1457_vm11 = vweird.f32 %v1591_v58 }
 0xb6f   :  { %vm1458_vm13 = vmor %vm1456_vm12, %vm1457_vm11 }
 0xb70   :  { %v1452_v57 = vmul.f32 %v1591_v58, %v1451_v59 }
 0xb72   :  { %v1453_v60 = vmul.f32 0.5, %v1452_v57 }
 0xb74   :  { %v1454_v61 = vsub.f32 1.5, %v1453_v60 }
 0xb76   :  { %v1455_v63 = vmul.f32 %v1591_v58, %v1454_v61 }
 0xb78   :  { %v1459_v0 = vsel %vm1458_vm13, %v1591_v58, %v1455_v63 }
 0xb79   :  { %v1460_v1 = vmul.f32 %v1459_v0, %v1448_v62 }
 0xb7b   :  { %1573 = vmatmul.msk.f32.vlgmr.msra.gmra.mxu3 %vm1342_vm10, %v1460_v1 }
 0xbfe   :  { %v1481_v8 = vpop.f32.mrf.mxu3 }
 0xbff   :  { %v1484_v9 = vperm.slane %v1481_v8, 0 }
 0xc01   :  { %v1485_v11 = vmul.f32 %v1484_v9, %v1399_v49 }
 0xc03   :  { %v1490_v12 = vadd.f32 %v1584_v10, %v1485_v11 }
 0xc05   :  { %v1491_v13 = vmul.f32 0.2, %v1490_v12 }
 0xc07   :  { %v1492_v14 = vmax.f32 %v1490_v12, %v1491_v13 }
 0xc09   :  { %1574 = vmatmul.msk.f32.vlgmr.msrb.gmra.mxu0 %vm1342_vm10, %v1492_v14 }
 0xc86   :  { %v1525_v16 = vpop.f32.mrf.mxu0 }
 0xc87   :  { %v1526_v17 = vadd.f32 %v1585_v15, %v1525_v16 }
 0xc89   :  { %1529 = vst.msk [vmem:[#allocation7] sm:$0x3] %vm1528_vm14, %v1526_v17 }
 0xc8a   :  { %1540 = dma.vmem_to_hbm [thread:$0]  %s1536_s19, 32, %s1538_s12, [#allocation4]  }
 0xc8b   :  { %1668 = dma.done.wait [#allocation4], 32  }
 0xc8c   :  { %1669 = vsyncadd [#allocation4], 4294967264 }
 0xc8d   :  { %1545 = vsyncpa [#allocation3], 1 }
 0xc8e   :  { %1546 = vsyncpa [#allocation6], 1 }
 0xc8f   :  { %1547 = vsyncpa [#allocation4], 1 }

</bundles_post_ra>
